<compile_context>
chip_gen: v7x
topology: tpu7x:2x2x1
jax: 0.10.0
libtpu: 0.0.40
codegen_flags: <defaults>
</compile_context>

<pallas_src>
import functools

import jax
import jax.numpy as jnp
from jax.experimental import pallas as pl
from jax.experimental.pallas import tpu as pltpu


def _pfn_kernel(x_ref, w_ref, b_ref, o_ref, *, chunk):
    # x_ref: (1, W, Cin, TH)  point-major input block
    # w_ref: (Cout, Cin)      1x1-conv weight with BN scale folded in
    # b_ref: (Cout, 1)        folded BN bias
    # o_ref: (1, Cout, TH)    per-pillar max features (lane-dense last dim)
    n_points = x_ref.shape[1]                      # W (static)
    th = o_ref.shape[-1]                           # TH (static)

    wm = w_ref[...]                                # hoisted: reused by every dot
    bias = b_ref[...]

    for j in range(th // chunk):                   # bound live ranges per chunk
        lo, hi = j * chunk, (j + 1) * chunk
        # Running max over the W points: per-point dot (Cout,Cin)@(Cin,chunk)
        # with a register-resident (Cout, chunk) accumulator.
        acc = jnp.dot(wm, x_ref[0, 0, :, lo:hi],
                      preferred_element_type=jnp.float32)
        for w in range(1, n_points):
            part = jnp.dot(wm, x_ref[0, w, :, lo:hi],
                           preferred_element_type=jnp.float32)
            acc = jnp.maximum(acc, part)
        # Bias + ReLU after the max (exactly equal to max(relu(Wx + b))).
        o_ref[0, :, lo:hi] = jnp.maximum(acc + bias, 0.0)


def pfn_layer_forward(x_nchw, weight, bn_gamma, bn_beta, bn_mean, bn_var,
                      eps=1e-3, tile_h=1024):
    """PFNLayer.forward (eval mode).

    x_nchw: (N, Cin, H=num_pillars, W=num_points=32) float32 (NCHW).
    weight: Conv2d weight (Cout, Cin, 1, 1).
    Returns (N, Cout, H, 1) float32 (NCHW, pooled point axis).
    """
    N, Cin, H, W = x_nchw.shape
    assert W == 32, "PFNLayer eval-mode pooling (1,4)->(1,4)->(1,2) assumes 32 points"
    Cout = weight.shape[0]

    # --- fold BatchNorm (inference) into the conv weight and a bias vector ---
    inv_std = 1.0 / jnp.sqrt(bn_var.astype(jnp.float32) + eps)
    scale = bn_gamma.astype(jnp.float32) * inv_std                          # (Cout,)
    w2 = weight.reshape(Cout, Cin).astype(jnp.float32) * scale[:, None]     # (Cout, Cin)
    b2 = (bn_beta.astype(jnp.float32)
          - bn_mean.astype(jnp.float32) * scale).reshape(Cout, 1)           # (Cout, 1)

    # --- pillar-axis tiling: lane-dense tiles, no padding (cdiv grid) ---------
    if H <= tile_h:
        tile_h = H                               # full-extent block (any H allowed)
    else:
        tile_h = max(128, (tile_h // 128) * 128)  # multiple of 128 -> lane-dense
    grid_h = pl.cdiv(H, tile_h)                  # last block partial, Pallas-masked
    chunk = 512 if tile_h % 512 == 0 else tile_h # in-kernel sub-tile (vreg budget)

    # Point-major layout (N, W, Cin, H): in-kernel x_ref[0, w] is a free
    # leading-dim (Cin, tile_h) view; DMA per block is 4 KiB-contiguous rows.
    xt = jnp.transpose(x_nchw.astype(jnp.float32), (0, 3, 1, 2))

    out = pl.pallas_call(
        functools.partial(_pfn_kernel, chunk=chunk),
        out_shape=jax.ShapeDtypeStruct((N, Cout, H), jnp.float32),
        grid_spec=pltpu.PrefetchScalarGridSpec(
            num_scalar_prefetch=0,
            grid=(N, grid_h),
            in_specs=[
                pl.BlockSpec((1, W, Cin, tile_h), lambda n, g: (n, 0, 0, g)),
                pl.BlockSpec((Cout, Cin), lambda n, g: (0, 0)),
                pl.BlockSpec((Cout, 1), lambda n, g: (0, 0)),
            ],
            out_specs=pl.BlockSpec((1, Cout, tile_h), lambda n, g: (n, 0, g)),
        ),
        compiler_params=pltpu.CompilerParams(
            dimension_semantics=("parallel", "parallel"),
        ),
    )(xt, w2, b2)

    # (N, Cout, H) is already NCHW over pillars; add the pooled W=1 dim.
    return out[..., None]


def _reference(x, weight, gamma, beta, mean, var, eps=1e-3):
    """Plain-JAX reference of the PyTorch forward (eval mode)."""
    N, Cin, H, W = x.shape
    Cout = weight.shape[0]
    y = jnp.einsum('nchw,oc->nohw', x, weight.reshape(Cout, Cin))
    y = (y - mean[None, :, None, None]) / jnp.sqrt(var[None, :, None, None] + eps)
    y = y * gamma[None, :, None, None] + beta[None, :, None, None]
    y = jnp.maximum(y, 0.0)
    # maxpool (1,4)->(1,4)->(1,2) over W=32 == max over point axis, keepdim
    return jnp.max(y, axis=3, keepdims=True)


if __name__ == "__main__":
    key = jax.random.PRNGKey(0)
    k1, k2, k3, k4, k5, k6 = jax.random.split(key, 6)

    # PFNLayer(in_channels=10, out_channels=64, use_norm=True, last_layer=False)
    #   -> effective Cout = 64 // 2 = 32; eval-mode forward.
    N, Cin, H, W = 2, 10, 16, 32
    Cout = 64 // 2

    x = jax.random.normal(k1, (N, Cin, H, W), jnp.float32)
    weight = jax.random.normal(k2, (Cout, Cin, 1, 1), jnp.float32) * 0.1  # Conv2d weight
    bn_gamma = jax.random.uniform(k3, (Cout,), jnp.float32, minval=0.5, maxval=1.5)
    bn_beta = jax.random.normal(k4, (Cout,), jnp.float32) * 0.1
    bn_mean = jax.random.normal(k5, (Cout,), jnp.float32) * 0.1
    bn_var = jax.random.uniform(k6, (Cout,), jnp.float32, minval=0.5, maxval=1.5)

    out = pfn_layer_forward(x, weight, bn_gamma, bn_beta, bn_mean, bn_var)
    out = jax.block_until_ready(out)

    ref = _reference(x, weight, bn_gamma, bn_beta, bn_mean, bn_var)
    assert out.shape == (N, Cout, H, 1), out.shape
    assert jnp.allclose(out, ref, atol=1e-4, rtol=1e-4), float(jnp.max(jnp.abs(out - ref)))
    print("KERNEL_OK")
</pallas_src>

<mosaic_0001>
module attributes {stable_mosaic.version = 11 : i64} {
  func.func @_pfn_kernel(%arg0: i32, %arg1: i32, %arg2: memref<1x32x10x16xf32, #tpu.memory_space<vmem>>, %arg3: memref<32x10xf32, #tpu.memory_space<vmem>>, %arg4: memref<32x1xf32, #tpu.memory_space<vmem>>, %arg5: memref<1x32x16xf32, #tpu.memory_space<vmem>>) attributes {dimension_semantics = [#tpu.dimension_semantics<parallel>, #tpu.dimension_semantics<parallel>], iteration_bounds = array<i64: 2, 1>, scalar_prefetch = 0 : i64, scratch_operands = 0 : i64, tpu.core_type = #tpu.core_type<tc>, window_params = [{transform_indices = @transform_0, window_bounds = array<i64: 1, 32, 10, 16>}, {pipeline_mode = #tpu.pipeline_mode<synchronous>, transform_indices = @transform_1, window_bounds = array<i64: 32, 10>}, {pipeline_mode = #tpu.pipeline_mode<synchronous>, transform_indices = @transform_2, window_bounds = array<i64: 32, 1>}, {transform_indices = @transform_3, window_bounds = array<i64: 1, 32, 16>}]} {
    %c0 = arith.constant 0 : index
    %c0_0 = arith.constant 0 : index
    %0 = vector.load %arg3[%c0, %c0_0] : memref<32x10xf32, #tpu.memory_space<vmem>>, vector<32x10xf32>
    %c0_1 = arith.constant 0 : index
    %c0_2 = arith.constant 0 : index
    %1 = vector.load %arg4[%c0_1, %c0_2] : memref<32x1xf32, #tpu.memory_space<vmem>>, vector<32x1xf32>
    %c0_3 = arith.constant 0 : index
    %c0_4 = arith.constant 0 : index
    %c0_5 = arith.constant 0 : index
    %c0_6 = arith.constant 0 : index
    %2 = vector.load %arg2[%c0_3, %c0_4, %c0_5, %c0_6] : memref<1x32x10x16xf32, #tpu.memory_space<vmem>>, vector<1x1x10x16xf32>
    %3 = vector.shape_cast %2 : vector<1x1x10x16xf32> to vector<10x16xf32>
    %cst = arith.constant dense<0.000000e+00> : vector<32x16xf32>
    %4 = tpu.matmul %0, %3, %cst {dimension_numbers = #tpu.dot_dimension_numbers<[1], [0], [0], [1], [0, 0, 1, 1], [], []>} : vector<32x10xf32>, vector<10x16xf32>, vector<32x16xf32> -> vector<32x16xf32>
    %c0_7 = arith.constant 0 : index
    %c1 = arith.constant 1 : index
    %c0_8 = arith.constant 0 : index
    %c0_9 = arith.constant 0 : index
    %5 = vector.load %arg2[%c0_7, %c1, %c0_8, %c0_9] : memref<1x32x10x16xf32, #tpu.memory_space<vmem>>, vector<1x1x10x16xf32>
    %6 = vector.shape_cast %5 : vector<1x1x10x16xf32> to vector<10x16xf32>
    %cst_10 = arith.constant dense<0.000000e+00> : vector<32x16xf32>
    %7 = tpu.matmul %0, %6, %cst_10 {dimension_numbers = #tpu.dot_dimension_numbers<[1], [0], [0], [1], [0, 0, 1, 1], [], []>} : vector<32x10xf32>, vector<10x16xf32>, vector<32x16xf32> -> vector<32x16xf32>
    %8 = arith.maximumf %4, %7 : vector<32x16xf32>
    %c0_11 = arith.constant 0 : index
    %c2 = arith.constant 2 : index
    %c0_12 = arith.constant 0 : index
    %c0_13 = arith.constant 0 : index
    %9 = vector.load %arg2[%c0_11, %c2, %c0_12, %c0_13] : memref<1x32x10x16xf32, #tpu.memory_space<vmem>>, vector<1x1x10x16xf32>
    %10 = vector.shape_cast %9 : vector<1x1x10x16xf32> to vector<10x16xf32>
    %cst_14 = arith.constant dense<0.000000e+00> : vector<32x16xf32>
    %11 = tpu.matmul %0, %10, %cst_14 {dimension_numbers = #tpu.dot_dimension_numbers<[1], [0], [0], [1], [0, 0, 1, 1], [], []>} : vector<32x10xf32>, vector<10x16xf32>, vector<32x16xf32> -> vector<32x16xf32>
    %12 = arith.maximumf %8, %11 : vector<32x16xf32>
    %c0_15 = arith.constant 0 : index
    %c3 = arith.constant 3 : index
    %c0_16 = arith.constant 0 : index
    %c0_17 = arith.constant 0 : index
    %13 = vector.load %arg2[%c0_15, %c3, %c0_16, %c0_17] : memref<1x32x10x16xf32, #tpu.memory_space<vmem>>, vector<1x1x10x16xf32>
    %14 = vector.shape_cast %13 : vector<1x1x10x16xf32> to vector<10x16xf32>
    %cst_18 = arith.constant dense<0.000000e+00> : vector<32x16xf32>
    %15 = tpu.matmul %0, %14, %cst_18 {dimension_numbers = #tpu.dot_dimension_numbers<[1], [0], [0], [1], [0, 0, 1, 1], [], []>} : vector<32x10xf32>, vector<10x16xf32>, vector<32x16xf32> -> vector<32x16xf32>
    %16 = arith.maximumf %12, %15 : vector<32x16xf32>
    %c0_19 = arith.constant 0 : index
    %c4 = arith.constant 4 : index
    %c0_20 = arith.constant 0 : index
    %c0_21 = arith.constant 0 : index
    %17 = vector.load %arg2[%c0_19, %c4, %c0_20, %c0_21] : memref<1x32x10x16xf32, #tpu.memory_space<vmem>>, vector<1x1x10x16xf32>
    %18 = vector.shape_cast %17 : vector<1x1x10x16xf32> to vector<10x16xf32>
    %cst_22 = arith.constant dense<0.000000e+00> : vector<32x16xf32>
    %19 = tpu.matmul %0, %18, %cst_22 {dimension_numbers = #tpu.dot_dimension_numbers<[1], [0], [0], [1], [0, 0, 1, 1], [], []>} : vector<32x10xf32>, vector<10x16xf32>, vector<32x16xf32> -> vector<32x16xf32>
    %20 = arith.maximumf %16, %19 : vector<32x16xf32>
    %c0_23 = arith.constant 0 : index
    %c5 = arith.constant 5 : index
    %c0_24 = arith.constant 0 : index
    %c0_25 = arith.constant 0 : index
    %21 = vector.load %arg2[%c0_23, %c5, %c0_24, %c0_25] : memref<1x32x10x16xf32, #tpu.memory_space<vmem>>, vector<1x1x10x16xf32>
    %22 = vector.shape_cast %21 : vector<1x1x10x16xf32> to vector<10x16xf32>
    %cst_26 = arith.constant dense<0.000000e+00> : vector<32x16xf32>
    %23 = tpu.matmul %0, %22, %cst_26 {dimension_numbers = #tpu.dot_dimension_numbers<[1], [0], [0], [1], [0, 0, 1, 1], [], []>} : vector<32x10xf32>, vector<10x16xf32>, vector<32x16xf32> -> vector<32x16xf32>
    %24 = arith.maximumf %20, %23 : vector<32x16xf32>
    %c0_27 = arith.constant 0 : index
    %c6 = arith.constant 6 : index
    %c0_28 = arith.constant 0 : index
    %c0_29 = arith.constant 0 : index
    %25 = vector.load %arg2[%c0_27, %c6, %c0_28, %c0_29] : memref<1x32x10x16xf32, #tpu.memory_space<vmem>>, vector<1x1x10x16xf32>
    %26 = vector.shape_cast %25 : vector<1x1x10x16xf32> to vector<10x16xf32>
    %cst_30 = arith.constant dense<0.000000e+00> : vector<32x16xf32>
    %27 = tpu.matmul %0, %26, %cst_30 {dimension_numbers = #tpu.dot_dimension_numbers<[1], [0], [0], [1], [0, 0, 1, 1], [], []>} : vector<32x10xf32>, vector<10x16xf32>, vector<32x16xf32> -> vector<32x16xf32>
    %28 = arith.maximumf %24, %27 : vector<32x16xf32>
    %c0_31 = arith.constant 0 : index
    %c7 = arith.constant 7 : index
    %c0_32 = arith.constant 0 : index
    %c0_33 = arith.constant 0 : index
    %29 = vector.load %arg2[%c0_31, %c7, %c0_32, %c0_33] : memref<1x32x10x16xf32, #tpu.memory_space<vmem>>, vector<1x1x10x16xf32>
    %30 = vector.shape_cast %29 : vector<1x1x10x16xf32> to vector<10x16xf32>
    %cst_34 = arith.constant dense<0.000000e+00> : vector<32x16xf32>
    %31 = tpu.matmul %0, %30, %cst_34 {dimension_numbers = #tpu.dot_dimension_numbers<[1], [0], [0], [1], [0, 0, 1, 1], [], []>} : vector<32x10xf32>, vector<10x16xf32>, vector<32x16xf32> -> vector<32x16xf32>
    %32 = arith.maximumf %28, %31 : vector<32x16xf32>
    %c0_35 = arith.constant 0 : index
    %c8 = arith.constant 8 : index
    %c0_36 = arith.constant 0 : index
    %c0_37 = arith.constant 0 : index
    %33 = vector.load %arg2[%c0_35, %c8, %c0_36, %c0_37] : memref<1x32x10x16xf32, #tpu.memory_space<vmem>>, vector<1x1x10x16xf32>
    %34 = vector.shape_cast %33 : vector<1x1x10x16xf32> to vector<10x16xf32>
    %cst_38 = arith.constant dense<0.000000e+00> : vector<32x16xf32>
    %35 = tpu.matmul %0, %34, %cst_38 {dimension_numbers = #tpu.dot_dimension_numbers<[1], [0], [0], [1], [0, 0, 1, 1], [], []>} : vector<32x10xf32>, vector<10x16xf32>, vector<32x16xf32> -> vector<32x16xf32>
    %36 = arith.maximumf %32, %35 : vector<32x16xf32>
    %c0_39 = arith.constant 0 : index
    %c9 = arith.constant 9 : index
    %c0_40 = arith.constant 0 : index
    %c0_41 = arith.constant 0 : index
    %37 = vector.load %arg2[%c0_39, %c9, %c0_40, %c0_41] : memref<1x32x10x16xf32, #tpu.memory_space<vmem>>, vector<1x1x10x16xf32>
    %38 = vector.shape_cast %37 : vector<1x1x10x16xf32> to vector<10x16xf32>
    %cst_42 = arith.constant dense<0.000000e+00> : vector<32x16xf32>
    %39 = tpu.matmul %0, %38, %cst_42 {dimension_numbers = #tpu.dot_dimension_numbers<[1], [0], [0], [1], [0, 0, 1, 1], [], []>} : vector<32x10xf32>, vector<10x16xf32>, vector<32x16xf32> -> vector<32x16xf32>
    %40 = arith.maximumf %36, %39 : vector<32x16xf32>
    %c0_43 = arith.constant 0 : index
    %c10 = arith.constant 10 : index
    %c0_44 = arith.constant 0 : index
    %c0_45 = arith.constant 0 : index
    %41 = vector.load %arg2[%c0_43, %c10, %c0_44, %c0_45] : memref<1x32x10x16xf32, #tpu.memory_space<vmem>>, vector<1x1x10x16xf32>
    %42 = vector.shape_cast %41 : vector<1x1x10x16xf32> to vector<10x16xf32>
    %cst_46 = arith.constant dense<0.000000e+00> : vector<32x16xf32>
    %43 = tpu.matmul %0, %42, %cst_46 {dimension_numbers = #tpu.dot_dimension_numbers<[1], [0], [0], [1], [0, 0, 1, 1], [], []>} : vector<32x10xf32>, vector<10x16xf32>, vector<32x16xf32> -> vector<32x16xf32>
    %44 = arith.maximumf %40, %43 : vector<32x16xf32>
    %c0_47 = arith.constant 0 : index
    %c11 = arith.constant 11 : index
    %c0_48 = arith.constant 0 : index
    %c0_49 = arith.constant 0 : index
    %45 = vector.load %arg2[%c0_47, %c11, %c0_48, %c0_49] : memref<1x32x10x16xf32, #tpu.memory_space<vmem>>, vector<1x1x10x16xf32>
    %46 = vector.shape_cast %45 : vector<1x1x10x16xf32> to vector<10x16xf32>
    %cst_50 = arith.constant dense<0.000000e+00> : vector<32x16xf32>
    %47 = tpu.matmul %0, %46, %cst_50 {dimension_numbers = #tpu.dot_dimension_numbers<[1], [0], [0], [1], [0, 0, 1, 1], [], []>} : vector<32x10xf32>, vector<10x16xf32>, vector<32x16xf32> -> vector<32x16xf32>
    %48 = arith.maximumf %44, %47 : vector<32x16xf32>
    %c0_51 = arith.constant 0 : index
    %c12 = arith.constant 12 : index
    %c0_52 = arith.constant 0 : index
    %c0_53 = arith.constant 0 : index
    %49 = vector.load %arg2[%c0_51, %c12, %c0_52, %c0_53] : memref<1x32x10x16xf32, #tpu.memory_space<vmem>>, vector<1x1x10x16xf32>
    %50 = vector.shape_cast %49 : vector<1x1x10x16xf32> to vector<10x16xf32>
    %cst_54 = arith.constant dense<0.000000e+00> : vector<32x16xf32>
    %51 = tpu.matmul %0, %50, %cst_54 {dimension_numbers = #tpu.dot_dimension_numbers<[1], [0], [0], [1], [0, 0, 1, 1], [], []>} : vector<32x10xf32>, vector<10x16xf32>, vector<32x16xf32> -> vector<32x16xf32>
    %52 = arith.maximumf %48, %51 : vector<32x16xf32>
    %c0_55 = arith.constant 0 : index
    %c13 = arith.constant 13 : index
    %c0_56 = arith.constant 0 : index
    %c0_57 = arith.constant 0 : index
    %53 = vector.load %arg2[%c0_55, %c13, %c0_56, %c0_57] : memref<1x32x10x16xf32, #tpu.memory_space<vmem>>, vector<1x1x10x16xf32>
    %54 = vector.shape_cast %53 : vector<1x1x10x16xf32> to vector<10x16xf32>
    %cst_58 = arith.constant dense<0.000000e+00> : vector<32x16xf32>
    %55 = tpu.matmul %0, %54, %cst_58 {dimension_numbers = #tpu.dot_dimension_numbers<[1], [0], [0], [1], [0, 0, 1, 1], [], []>} : vector<32x10xf32>, vector<10x16xf32>, vector<32x16xf32> -> vector<32x16xf32>
    %56 = arith.maximumf %52, %55 : vector<32x16xf32>
    %c0_59 = arith.constant 0 : index
    %c14 = arith.constant 14 : index
    %c0_60 = arith.constant 0 : index
    %c0_61 = arith.constant 0 : index
    %57 = vector.load %arg2[%c0_59, %c14, %c0_60, %c0_61] : memref<1x32x10x16xf32, #tpu.memory_space<vmem>>, vector<1x1x10x16xf32>
    %58 = vector.shape_cast %57 : vector<1x1x10x16xf32> to vector<10x16xf32>
    %cst_62 = arith.constant dense<0.000000e+00> : vector<32x16xf32>
    %59 = tpu.matmul %0, %58, %cst_62 {dimension_numbers = #tpu.dot_dimension_numbers<[1], [0], [0], [1], [0, 0, 1, 1], [], []>} : vector<32x10xf32>, vector<10x16xf32>, vector<32x16xf32> -> vector<32x16xf32>
    %60 = arith.maximumf %56, %59 : vector<32x16xf32>
    %c0_63 = arith.constant 0 : index
    %c15 = arith.constant 15 : index
    %c0_64 = arith.constant 0 : index
    %c0_65 = arith.constant 0 : index
    %61 = vector.load %arg2[%c0_63, %c15, %c0_64, %c0_65] : memref<1x32x10x16xf32, #tpu.memory_space<vmem>>, vector<1x1x10x16xf32>
    %62 = vector.shape_cast %61 : vector<1x1x10x16xf32> to vector<10x16xf32>
    %cst_66 = arith.constant dense<0.000000e+00> : vector<32x16xf32>
    %63 = tpu.matmul %0, %62, %cst_66 {dimension_numbers = #tpu.dot_dimension_numbers<[1], [0], [0], [1], [0, 0, 1, 1], [], []>} : vector<32x10xf32>, vector<10x16xf32>, vector<32x16xf32> -> vector<32x16xf32>
    %64 = arith.maximumf %60, %63 : vector<32x16xf32>
    %c0_67 = arith.constant 0 : index
    %c16 = arith.constant 16 : index
    %c0_68 = arith.constant 0 : index
    %c0_69 = arith.constant 0 : index
    %65 = vector.load %arg2[%c0_67, %c16, %c0_68, %c0_69] : memref<1x32x10x16xf32, #tpu.memory_space<vmem>>, vector<1x1x10x16xf32>
    %66 = vector.shape_cast %65 : vector<1x1x10x16xf32> to vector<10x16xf32>
    %cst_70 = arith.constant dense<0.000000e+00> : vector<32x16xf32>
    %67 = tpu.matmul %0, %66, %cst_70 {dimension_numbers = #tpu.dot_dimension_numbers<[1], [0], [0], [1], [0, 0, 1, 1], [], []>} : vector<32x10xf32>, vector<10x16xf32>, vector<32x16xf32> -> vector<32x16xf32>
    %68 = arith.maximumf %64, %67 : vector<32x16xf32>
    %c0_71 = arith.constant 0 : index
    %c17 = arith.constant 17 : index
    %c0_72 = arith.constant 0 : index
    %c0_73 = arith.constant 0 : index
    %69 = vector.load %arg2[%c0_71, %c17, %c0_72, %c0_73] : memref<1x32x10x16xf32, #tpu.memory_space<vmem>>, vector<1x1x10x16xf32>
    %70 = vector.shape_cast %69 : vector<1x1x10x16xf32> to vector<10x16xf32>
    %cst_74 = arith.constant dense<0.000000e+00> : vector<32x16xf32>
    %71 = tpu.matmul %0, %70, %cst_74 {dimension_numbers = #tpu.dot_dimension_numbers<[1], [0], [0], [1], [0, 0, 1, 1], [], []>} : vector<32x10xf32>, vector<10x16xf32>, vector<32x16xf32> -> vector<32x16xf32>
    %72 = arith.maximumf %68, %71 : vector<32x16xf32>
    %c0_75 = arith.constant 0 : index
    %c18 = arith.constant 18 : index
    %c0_76 = arith.constant 0 : index
    %c0_77 = arith.constant 0 : index
    %73 = vector.load %arg2[%c0_75, %c18, %c0_76, %c0_77] : memref<1x32x10x16xf32, #tpu.memory_space<vmem>>, vector<1x1x10x16xf32>
    %74 = vector.shape_cast %73 : vector<1x1x10x16xf32> to vector<10x16xf32>
    %cst_78 = arith.constant dense<0.000000e+00> : vector<32x16xf32>
    %75 = tpu.matmul %0, %74, %cst_78 {dimension_numbers = #tpu.dot_dimension_numbers<[1], [0], [0], [1], [0, 0, 1, 1], [], []>} : vector<32x10xf32>, vector<10x16xf32>, vector<32x16xf32> -> vector<32x16xf32>
    %76 = arith.maximumf %72, %75 : vector<32x16xf32>
    %c0_79 = arith.constant 0 : index
    %c19 = arith.constant 19 : index
    %c0_80 = arith.constant 0 : index
    %c0_81 = arith.constant 0 : index
    %77 = vector.load %arg2[%c0_79, %c19, %c0_80, %c0_81] : memref<1x32x10x16xf32, #tpu.memory_space<vmem>>, vector<1x1x10x16xf32>
    %78 = vector.shape_cast %77 : vector<1x1x10x16xf32> to vector<10x16xf32>
    %cst_82 = arith.constant dense<0.000000e+00> : vector<32x16xf32>
    %79 = tpu.matmul %0, %78, %cst_82 {dimension_numbers = #tpu.dot_dimension_numbers<[1], [0], [0], [1], [0, 0, 1, 1], [], []>} : vector<32x10xf32>, vector<10x16xf32>, vector<32x16xf32> -> vector<32x16xf32>
    %80 = arith.maximumf %76, %79 : vector<32x16xf32>
    %c0_83 = arith.constant 0 : index
    %c20 = arith.constant 20 : index
    %c0_84 = arith.constant 0 : index
    %c0_85 = arith.constant 0 : index
    %81 = vector.load %arg2[%c0_83, %c20, %c0_84, %c0_85] : memref<1x32x10x16xf32, #tpu.memory_space<vmem>>, vector<1x1x10x16xf32>
    %82 = vector.shape_cast %81 : vector<1x1x10x16xf32> to vector<10x16xf32>
    %cst_86 = arith.constant dense<0.000000e+00> : vector<32x16xf32>
    %83 = tpu.matmul %0, %82, %cst_86 {dimension_numbers = #tpu.dot_dimension_numbers<[1], [0], [0], [1], [0, 0, 1, 1], [], []>} : vector<32x10xf32>, vector<10x16xf32>, vector<32x16xf32> -> vector<32x16xf32>
    %84 = arith.maximumf %80, %83 : vector<32x16xf32>
    %c0_87 = arith.constant 0 : index
    %c21 = arith.constant 21 : index
    %c0_88 = arith.constant 0 : index
    %c0_89 = arith.constant 0 : index
    %85 = vector.load %arg2[%c0_87, %c21, %c0_88, %c0_89] : memref<1x32x10x16xf32, #tpu.memory_space<vmem>>, vector<1x1x10x16xf32>
    %86 = vector.shape_cast %85 : vector<1x1x10x16xf32> to vector<10x16xf32>
    %cst_90 = arith.constant dense<0.000000e+00> : vector<32x16xf32>
    %87 = tpu.matmul %0, %86, %cst_90 {dimension_numbers = #tpu.dot_dimension_numbers<[1], [0], [0], [1], [0, 0, 1, 1], [], []>} : vector<32x10xf32>, vector<10x16xf32>, vector<32x16xf32> -> vector<32x16xf32>
    %88 = arith.maximumf %84, %87 : vector<32x16xf32>
    %c0_91 = arith.constant 0 : index
    %c22 = arith.constant 22 : index
    %c0_92 = arith.constant 0 : index
    %c0_93 = arith.constant 0 : index
    %89 = vector.load %arg2[%c0_91, %c22, %c0_92, %c0_93] : memref<1x32x10x16xf32, #tpu.memory_space<vmem>>, vector<1x1x10x16xf32>
    %90 = vector.shape_cast %89 : vector<1x1x10x16xf32> to vector<10x16xf32>
    %cst_94 = arith.constant dense<0.000000e+00> : vector<32x16xf32>
    %91 = tpu.matmul %0, %90, %cst_94 {dimension_numbers = #tpu.dot_dimension_numbers<[1], [0], [0], [1], [0, 0, 1, 1], [], []>} : vector<32x10xf32>, vector<10x16xf32>, vector<32x16xf32> -> vector<32x16xf32>
    %92 = arith.maximumf %88, %91 : vector<32x16xf32>
    %c0_95 = arith.constant 0 : index
    %c23 = arith.constant 23 : index
    %c0_96 = arith.constant 0 : index
    %c0_97 = arith.constant 0 : index
    %93 = vector.load %arg2[%c0_95, %c23, %c0_96, %c0_97] : memref<1x32x10x16xf32, #tpu.memory_space<vmem>>, vector<1x1x10x16xf32>
    %94 = vector.shape_cast %93 : vector<1x1x10x16xf32> to vector<10x16xf32>
    %cst_98 = arith.constant dense<0.000000e+00> : vector<32x16xf32>
    %95 = tpu.matmul %0, %94, %cst_98 {dimension_numbers = #tpu.dot_dimension_numbers<[1], [0], [0], [1], [0, 0, 1, 1], [], []>} : vector<32x10xf32>, vector<10x16xf32>, vector<32x16xf32> -> vector<32x16xf32>
    %96 = arith.maximumf %92, %95 : vector<32x16xf32>
    %c0_99 = arith.constant 0 : index
    %c24 = arith.constant 24 : index
    %c0_100 = arith.constant 0 : index
    %c0_101 = arith.constant 0 : index
    %97 = vector.load %arg2[%c0_99, %c24, %c0_100, %c0_101] : memref<1x32x10x16xf32, #tpu.memory_space<vmem>>, vector<1x1x10x16xf32>
    %98 = vector.shape_cast %97 : vector<1x1x10x16xf32> to vector<10x16xf32>
    %cst_102 = arith.constant dense<0.000000e+00> : vector<32x16xf32>
    %99 = tpu.matmul %0, %98, %cst_102 {dimension_numbers = #tpu.dot_dimension_numbers<[1], [0], [0], [1], [0, 0, 1, 1], [], []>} : vector<32x10xf32>, vector<10x16xf32>, vector<32x16xf32> -> vector<32x16xf32>
    %100 = arith.maximumf %96, %99 : vector<32x16xf32>
    %c0_103 = arith.constant 0 : index
    %c25 = arith.constant 25 : index
    %c0_104 = arith.constant 0 : index
    %c0_105 = arith.constant 0 : index
    %101 = vector.load %arg2[%c0_103, %c25, %c0_104, %c0_105] : memref<1x32x10x16xf32, #tpu.memory_space<vmem>>, vector<1x1x10x16xf32>
    %102 = vector.shape_cast %101 : vector<1x1x10x16xf32> to vector<10x16xf32>
    %cst_106 = arith.constant dense<0.000000e+00> : vector<32x16xf32>
    %103 = tpu.matmul %0, %102, %cst_106 {dimension_numbers = #tpu.dot_dimension_numbers<[1], [0], [0], [1], [0, 0, 1, 1], [], []>} : vector<32x10xf32>, vector<10x16xf32>, vector<32x16xf32> -> vector<32x16xf32>
    %104 = arith.maximumf %100, %103 : vector<32x16xf32>
    %c0_107 = arith.constant 0 : index
    %c26 = arith.constant 26 : index
    %c0_108 = arith.constant 0 : index
    %c0_109 = arith.constant 0 : index
    %105 = vector.load %arg2[%c0_107, %c26, %c0_108, %c0_109] : memref<1x32x10x16xf32, #tpu.memory_space<vmem>>, vector<1x1x10x16xf32>
    %106 = vector.shape_cast %105 : vector<1x1x10x16xf32> to vector<10x16xf32>
    %cst_110 = arith.constant dense<0.000000e+00> : vector<32x16xf32>
    %107 = tpu.matmul %0, %106, %cst_110 {dimension_numbers = #tpu.dot_dimension_numbers<[1], [0], [0], [1], [0, 0, 1, 1], [], []>} : vector<32x10xf32>, vector<10x16xf32>, vector<32x16xf32> -> vector<32x16xf32>
    %108 = arith.maximumf %104, %107 : vector<32x16xf32>
    %c0_111 = arith.constant 0 : index
    %c27 = arith.constant 27 : index
    %c0_112 = arith.constant 0 : index
    %c0_113 = arith.constant 0 : index
    %109 = vector.load %arg2[%c0_111, %c27, %c0_112, %c0_113] : memref<1x32x10x16xf32, #tpu.memory_space<vmem>>, vector<1x1x10x16xf32>
    %110 = vector.shape_cast %109 : vector<1x1x10x16xf32> to vector<10x16xf32>
    %cst_114 = arith.constant dense<0.000000e+00> : vector<32x16xf32>
    %111 = tpu.matmul %0, %110, %cst_114 {dimension_numbers = #tpu.dot_dimension_numbers<[1], [0], [0], [1], [0, 0, 1, 1], [], []>} : vector<32x10xf32>, vector<10x16xf32>, vector<32x16xf32> -> vector<32x16xf32>
    %112 = arith.maximumf %108, %111 : vector<32x16xf32>
    %c0_115 = arith.constant 0 : index
    %c28 = arith.constant 28 : index
    %c0_116 = arith.constant 0 : index
    %c0_117 = arith.constant 0 : index
    %113 = vector.load %arg2[%c0_115, %c28, %c0_116, %c0_117] : memref<1x32x10x16xf32, #tpu.memory_space<vmem>>, vector<1x1x10x16xf32>
    %114 = vector.shape_cast %113 : vector<1x1x10x16xf32> to vector<10x16xf32>
    %cst_118 = arith.constant dense<0.000000e+00> : vector<32x16xf32>
    %115 = tpu.matmul %0, %114, %cst_118 {dimension_numbers = #tpu.dot_dimension_numbers<[1], [0], [0], [1], [0, 0, 1, 1], [], []>} : vector<32x10xf32>, vector<10x16xf32>, vector<32x16xf32> -> vector<32x16xf32>
    %116 = arith.maximumf %112, %115 : vector<32x16xf32>
    %c0_119 = arith.constant 0 : index
    %c29 = arith.constant 29 : index
    %c0_120 = arith.constant 0 : index
    %c0_121 = arith.constant 0 : index
    %117 = vector.load %arg2[%c0_119, %c29, %c0_120, %c0_121] : memref<1x32x10x16xf32, #tpu.memory_space<vmem>>, vector<1x1x10x16xf32>
    %118 = vector.shape_cast %117 : vector<1x1x10x16xf32> to vector<10x16xf32>
    %cst_122 = arith.constant dense<0.000000e+00> : vector<32x16xf32>
    %119 = tpu.matmul %0, %118, %cst_122 {dimension_numbers = #tpu.dot_dimension_numbers<[1], [0], [0], [1], [0, 0, 1, 1], [], []>} : vector<32x10xf32>, vector<10x16xf32>, vector<32x16xf32> -> vector<32x16xf32>
    %120 = arith.maximumf %116, %119 : vector<32x16xf32>
    %c0_123 = arith.constant 0 : index
    %c30 = arith.constant 30 : index
    %c0_124 = arith.constant 0 : index
    %c0_125 = arith.constant 0 : index
    %121 = vector.load %arg2[%c0_123, %c30, %c0_124, %c0_125] : memref<1x32x10x16xf32, #tpu.memory_space<vmem>>, vector<1x1x10x16xf32>
    %122 = vector.shape_cast %121 : vector<1x1x10x16xf32> to vector<10x16xf32>
    %cst_126 = arith.constant dense<0.000000e+00> : vector<32x16xf32>
    %123 = tpu.matmul %0, %122, %cst_126 {dimension_numbers = #tpu.dot_dimension_numbers<[1], [0], [0], [1], [0, 0, 1, 1], [], []>} : vector<32x10xf32>, vector<10x16xf32>, vector<32x16xf32> -> vector<32x16xf32>
    %124 = arith.maximumf %120, %123 : vector<32x16xf32>
    %c0_127 = arith.constant 0 : index
    %c31 = arith.constant 31 : index
    %c0_128 = arith.constant 0 : index
    %c0_129 = arith.constant 0 : index
    %125 = vector.load %arg2[%c0_127, %c31, %c0_128, %c0_129] : memref<1x32x10x16xf32, #tpu.memory_space<vmem>>, vector<1x1x10x16xf32>
    %126 = vector.shape_cast %125 : vector<1x1x10x16xf32> to vector<10x16xf32>
    %cst_130 = arith.constant dense<0.000000e+00> : vector<32x16xf32>
    %127 = tpu.matmul %0, %126, %cst_130 {dimension_numbers = #tpu.dot_dimension_numbers<[1], [0], [0], [1], [0, 0, 1, 1], [], []>} : vector<32x10xf32>, vector<10x16xf32>, vector<32x16xf32> -> vector<32x16xf32>
    %128 = arith.maximumf %124, %127 : vector<32x16xf32>
    %129 = vector.broadcast %1 : vector<32x1xf32> to vector<32x16xf32>
    %130 = arith.addf %128, %129 : vector<32x16xf32>
    %cst_131 = arith.constant 0.000000e+00 : f32
    %131 = vector.broadcast %cst_131 : f32 to vector<32x16xf32>
    %132 = arith.maximumf %130, %131 : vector<32x16xf32>
    %c0_132 = arith.constant 0 : index
    %c0_133 = arith.constant 0 : index
    %c0_134 = arith.constant 0 : index
    %133 = vector.load %arg5[%c0_132, %c0_133, %c0_134] : memref<1x32x16xf32, #tpu.memory_space<vmem>>, vector<1x32x16xf32>
    %134 = vector.shape_cast %133 : vector<1x32x16xf32> to vector<32x16xf32>
    %135 = vector.shape_cast %132 : vector<32x16xf32> to vector<1x32x16xf32>
    tpu.vector_store %arg5[%c0_132, %c0_133, %c0_134], %135 {strides = array<i32>} : memref<1x32x16xf32, #tpu.memory_space<vmem>>, vector<1x32x16xf32>,
    return
  }
  func.func @transform_0(%arg0: i32, %arg1: i32) -> (i32, i32, i32, i32) {
    %c0_i32 = arith.constant 0 : i32
    %c0_i32_0 = arith.constant 0 : i32
    %c0_i32_1 = arith.constant 0 : i32
    return %arg0, %c0_i32, %c0_i32_0, %arg1 : i32, i32, i32, i32
  }
  func.func @transform_1(%arg0: i32, %arg1: i32) -> (i32, i32) {
    %c0_i32 = arith.constant 0 : i32
    %c0_i32_0 = arith.constant 0 : i32
    %c0_i32_1 = arith.constant 0 : i32
    return %c0_i32, %c0_i32_0 : i32, i32
  }
  func.func @transform_2(%arg0: i32, %arg1: i32) -> (i32, i32) {
    %c0_i32 = arith.constant 0 : i32
    %c0_i32_0 = arith.constant 0 : i32
    %c0_i32_1 = arith.constant 0 : i32
    return %c0_i32, %c0_i32_0 : i32, i32
  }
  func.func @transform_3(%arg0: i32, %arg1: i32) -> (i32, i32, i32) {
    %c0_i32 = arith.constant 0 : i32
    %c0_i32_0 = arith.constant 0 : i32
    return %arg0, %c0_i32, %arg1 : i32, i32, i32
  }
}

</mosaic_0001>

<bundles_post_ra>
// kernel: tpu_custom_call.1
= control target key start
LH: loop header
LB: loop body
LE: loop exit
PB: predicated region body
PF: predicated region fallthrough
CT: control target
= control target key end

     0   :  { %s4388_s12 = smov 0   ;;  %s4390_s13 = smov 0   ;;  %s4911_s0 = inlined_call_operand.vmem [shape: f32[2,32,10,16], index: 0, kind: input, shape index: {}]   ;;  %s4912_s1 = inlined_call_operand.vmem [shape: f32[32,10], index: 1, kind: input, shape index: {}]   ;;  %s4913_s2 = inlined_call_operand.vmem [shape: f32[32,1], index: 2, kind: input, shape index: {}]   ;;  %s4914_s3 = inlined_call_operand.vmem [shape: f32[2,32,16], index: 3, kind: output, shape index: {}]  }
   0x1   :  { %s4392_s14 = smov 0  }
   0x2 LB: > { %s25_s15 = sadd.s32 1, %s4360_s13  ;;  %p3379_p0 = scmp.ge.s32.totalorder %s4364_s14, 1  ;;  %s4364_s14 = sphi %s4392_s14, %s13_s14   ;;  %s4360_s13 = sphi %s4390_s13, %s4918_s13   ;;  %s4356_s12 = sphi %s4388_s12, %s4917_s12  }
   0x3   : > { %p27_p1 = scmp.ge.s32.totalorder %s25_s15, 2  ;;  %p156_p2 = scmp.lt.s32.totalorder %s4364_s14, 3 }
   0x5   : > { %s4920_s15 = smov (%p27_p1, %s25_s15), 0  ;;  %p157_p3 = pnand %p3379_p0, %p156_p2 }
   0x6   : > { %p186_p4 = scmp.lt.s32.totalorder (!%p157_p3), %s4356_s12, 1  ;;  %v4409_v0 = vld [vmem:[%s4912_s1] sm:$0xff] (!%p157_p3)  ;;  %vm212_vm0 = vcmask (!%p157_p3), 80896   ;;  %vm225_vm1 = vcmask (!%p157_p3), 1041408   ;;  %vm4366_vm2 = vmmov (!%p157_p3), 1   ;;  %v4446_v16 = vld [vmem:[%s4912_s1 + $0x8] sm:$0xff] (!%p157_p3) }
   0x7   : > { %160 = sbr.rel (%p157_p3) target bundleno = 370 (0x172), region = 32  ;;  %3806 = vmatprep.mubr.msk.f32.mxu0 (!%p157_p3), %vm212_vm0, %v4409_v0  ;;  %3816 = vmatprep.mubr.msk.f32.mxu1 (!%p157_p3), %vm212_vm0, %v4409_v0  ;;  %vm4423_vm3 = vmpackc.low (!%p157_p3), %vm225_vm1, %vm4366_vm2  ;;  %v4459_v19 = vld [vmem:[%s4912_s1 + $0x10] sm:$0xff] (!%p157_p3)  ;;  %v4367_v21 = vmov (!%p157_p3), 0   ;;  %v4470_v23 = vld [vmem:[%s4912_s1 + $0x18] sm:$0xff] (!%p157_p3)  ;;  %vm3287_vm4 = vcmask (!%p157_p3), 130048  }
   0x8   : > { %4340 = vset.pattern.permute.xlu0 (!%p157_p3), %v4367_v21  ;;  %4341 = vset.pattern.permute.xlu1 (!%p157_p3), %v4367_v21  ;;  %v206_v34 = vld [vmem:[%s4913_s2] sm:$0xff] (!%p157_p3)  ;;  %v208_v35 = vld [vmem:[%s4913_s2 + $0x10] sm:$0xff] (!%p157_p3)  ;;  %v207_v38 = vld [vmem:[%s4913_s2 + $0x8] sm:$0xff] (!%p157_p3) }
   0x9   : > { %3261 = vperm.xlu0 (!%p157_p3), %4340, %v206_v34   ;;  %3271 = vperm.xlu1 (!%p157_p3), %4341, %v208_v35   ;;  %v209_v41 = vld [vmem:[%s4913_s2 + $0x18] sm:$0xff] (!%p157_p3) }
   0xd   : > { %3266 = vperm.xlu0 (!%p157_p3), %4340, %v207_v38   ;;  %3276 = vperm.xlu1 (!%p157_p3), %4341, %v209_v41  }
   0xe   : > { %s4922_s12 = smov (!%p186_p4, %s4356_s12), 1 }
   0xf   : > { %s3608_s18 = sshll.u32 %s4922_s12, 9  ;;  %s3609_s9 = sshll.u32 %s4922_s12, 5 }
  0x10   : > { %s4421_s21 = scalar_lea.vmem %s4911_s0, %s3608_s18  ;;  %s201_s16 = scalar_lea.vmem %s4914_s3, %s3609_s9 }
  0x11   : > { %v210_v2 = vld [vmem:[%s4421_s21] sm:$0xff]  ;;  %v211_v3 = vld [vmem:[%s4421_s21 + $0x8] sm:$0x3]  ;;  %v3389_v4 = vld [vmem:[%s4421_s21 + $0x10] sm:$0xff] }
  0x12   : > { %v4122_v5 = vpack.c.bf16 %v211_v3, %v210_v2  ;;  %v3390_v6 = vld [vmem:[%s4421_s21 + $0x18] sm:$0x3]  ;;  %v3396_v7 = vld [vmem:[%s4421_s21 + $0x20] sm:$0xff]  ;;  %v3397_v8 = vld [vmem:[%s4421_s21 + $0x28] sm:$0x3] }
  0x13   : > { %v4128_v9 = vpack.c.bf16 %v3390_v6, %v3389_v4  ;;  %v4134_v10 = vpack.c.bf16 %v3397_v8, %v3396_v7  ;;  %v3403_v11 = vld [vmem:[%s4421_s21 + $0x30] sm:$0xff]  ;;  %v3404_v12 = vld [vmem:[%s4421_s21 + $0x38] sm:$0x3]  ;;  %v3410_v14 = vld [vmem:[%s4421_s21 + $0x40] sm:$0xff] }
  0x14   : > { %4124 = vmatprep.subr.msk.bf16.mxu0 %vm4423_vm3, %v4122_v5  ;;  %v4140_v13 = vpack.c.bf16 %v3404_v12, %v3403_v11  ;;  %v3411_v15 = vld [vmem:[%s4421_s21 + $0x48] sm:$0x3]  ;;  %v3417_v17 = vld [vmem:[%s4421_s21 + $0x50] sm:$0xff]  ;;  %v3418_v18 = vld [vmem:[%s4421_s21 + $0x58] sm:$0x3] }
  0x15   : > { %4130 = vmatprep.subr.msk.bf16.mxu1 %vm4423_vm3, %v4128_v9  ;;  %4127 = vmatpush3.bf16.msk.msra.mxu0 %vm4423_vm3, %v4122_v5  ;;  %v4146_v20 = vpack.c.bf16 %v3411_v15, %v3410_v14  ;;  %v4152_v22 = vpack.c.bf16 %v3418_v18, %v3417_v17  ;;  %v3424_v24 = vld [vmem:[%s4421_s21 + $0x60] sm:$0xff]  ;;  %v3425_v25 = vld [vmem:[%s4421_s21 + $0x68] sm:$0x3]  ;;  %v3431_v26 = vld [vmem:[%s4421_s21 + $0x70] sm:$0xff] }
  0x16   : > { %4133 = vmatpush3.bf16.msk.msra.mxu1 %vm4423_vm3, %v4128_v9  ;;  %4136 = vmatprep.subr.msk.bf16.mxu0 %vm4423_vm3, %v4134_v10  ;;  %v3432_v27 = vld [vmem:[%s4421_s21 + $0x78] sm:$0x3]  ;;  %v4158_v28 = vpack.c.bf16 %v3425_v25, %v3424_v24  ;;  %v3438_v30 = vld [vmem:[%s4421_s21 + $0x80] sm:$0xff]  ;;  %v3439_v31 = vld [vmem:[%s4421_s21 + $0x88] sm:$0x3] }
  0x17   : > { %4142 = vmatprep.subr.msk.bf16.mxu1 %vm4423_vm3, %v4140_v13  ;;  %v4164_v29 = vpack.c.bf16 %v3432_v27, %v3431_v26  ;;  %v3445_v32 = vld [vmem:[%s4421_s21 + $0x90] sm:$0xff]  ;;  %v3446_v33 = vld [vmem:[%s4421_s21 + $0x98] sm:$0x3]  ;;  %v4170_v36 = vpack.c.bf16 %v3439_v31, %v3438_v30  ;;  %v3452_v39 = vld [vmem:[%s4421_s21 + $0xa0] sm:$0xff] }
  0x18   : > { %3807 = vmatmul.mubr.msk.f32.vlgmr.msra.gmra.mrb[0].mxu0 %vm212_vm0, %v4446_v16  ;;  %v4176_v37 = vpack.c.bf16 %v3446_v33, %v3445_v32  ;;  %v3453_v40 = vld [vmem:[%s4421_s21 + $0xa8] sm:$0x3]  ;;  %v3459_v42 = vld [vmem:[%s4421_s21 + $0xb0] sm:$0xff]  ;;  %v3460_v43 = vld [vmem:[%s4421_s21 + $0xb8] sm:$0x3] }
  0x19   : > { %3817 = vmatmul.mubr.msk.f32.vlgmr.msra.gmra.mrb[0].mxu1 %vm212_vm0, %v4446_v16  ;;  %4139 = vmatpush3.bf16.msk.msra.mxu0 %vm4423_vm3, %v4134_v10  ;;  %v4182_v44 = vpack.c.bf16 %v3453_v40, %v3452_v39  ;;  %v4188_v45 = vpack.c.bf16 %v3460_v43, %v3459_v42  ;;  %v3466_v46 = vld [vmem:[%s4421_s21 + $0xc0] sm:$0xff]  ;;  %v3467_v47 = vld [vmem:[%s4421_s21 + $0xc8] sm:$0x3]  ;;  %v3473_v48 = vld [vmem:[%s4421_s21 + $0xd0] sm:$0xff] }
  0x1a   : > { %3809 = vmatprep.mubr.msk.f32.mxu0 %vm212_vm0, %v4459_v19  ;;  %3819 = vmatprep.mubr.msk.f32.mxu1 %vm212_vm0, %v4459_v19  ;;  %v3474_v49 = vld [vmem:[%s4421_s21 + $0xd8] sm:$0x3]  ;;  %v4194_v50 = vpack.c.bf16 %v3467_v47, %v3466_v46  ;;  %v3480_v52 = vld [vmem:[%s4421_s21 + $0xe0] sm:$0xff]  ;;  %v3481_v53 = vld [vmem:[%s4421_s21 + $0xe8] sm:$0x3] }
  0x1b   : > { %4145 = vmatpush3.bf16.msk.msra.mxu1 %vm4423_vm3, %v4140_v13  ;;  %4148 = vmatprep.subr.msk.bf16.mxu0 %vm4423_vm3, %v4146_v20  ;;  %v4200_v51 = vpack.c.bf16 %v3474_v49, %v3473_v48  ;;  %v3487_v54 = vld [vmem:[%s4421_s21 + $0xf0] sm:$0xff]  ;;  %v3488_v55 = vld [vmem:[%s4421_s21 + $0xf8] sm:$0x3]  ;;  %v4206_v56 = vpack.c.bf16 %v3481_v53, %v3480_v52  ;;  %v3494_v58 = vld [vmem:[%s4421_s21 + $0x100] sm:$0xff] }
  0x1c   : > { %3810 = vmatmul.mubr.msk.f32.gmra.mrb[2].mxu0 %vm212_vm0, %v4470_v23  ;;  %4154 = vmatprep.subr.msk.bf16.mxu1 %vm4423_vm3, %v4152_v22  ;;  %v4212_v57 = vpack.c.bf16 %v3488_v55, %v3487_v54  ;;  %v3495_v59 = vld [vmem:[%s4421_s21 + $0x108] sm:$0x3]  ;;  %v3501_v60 = vld [vmem:[%s4421_s21 + $0x110] sm:$0xff]  ;;  %v3502_v61 = vld [vmem:[%s4421_s21 + $0x118] sm:$0x3] }
  0x1d   : > { %3820 = vmatmul.mubr.msk.f32.gmra.mrb[2].mxu1 %vm212_vm0, %v4470_v23  ;;  %3826 = vmatprep.mubr.msk.f32.mxu0 %vm212_vm0, %v4409_v0  ;;  %v4218_v62 = vpack.c.bf16 %v3495_v59, %v3494_v58  ;;  %v4224_v63 = vpack.c.bf16 %v3502_v61, %v3501_v60  ;;  %v3508_v2 = vld [vmem:[%s4421_s21 + $0x120] sm:$0xff]  ;;  %v3509_v3 = vld [vmem:[%s4421_s21 + $0x128] sm:$0x3]  ;;  %v3515_v4 = vld [vmem:[%s4421_s21 + $0x130] sm:$0xff] }
  0x1e   : > { %3836 = vmatprep.mubr.msk.f32.mxu1 %vm212_vm0, %v4409_v0  ;;  %v3516_v5 = vld [vmem:[%s4421_s21 + $0x138] sm:$0x3]  ;;  %v4230_v6 = vpack.c.bf16 %v3509_v3, %v3508_v2  ;;  %v3522_v8 = vld [vmem:[%s4421_s21 + $0x140] sm:$0xff]  ;;  %v3523_v9 = vld [vmem:[%s4421_s21 + $0x148] sm:$0x3] }
  0x1f   : > { %v4236_v7 = vpack.c.bf16 %v3516_v5, %v3515_v4  ;;  %v3529_v10 = vld [vmem:[%s4421_s21 + $0x150] sm:$0xff]  ;;  %v3530_v11 = vld [vmem:[%s4421_s21 + $0x158] sm:$0x3]  ;;  %v4242_v12 = vpack.c.bf16 %v3523_v9, %v3522_v8  ;;  %v3536_v14 = vld [vmem:[%s4421_s21 + $0x160] sm:$0xff] }
  0x20   : > { %3827 = vmatmul.mubr.msk.f32.vlgmr.msra.gmra.mrb[4].mxu0 %vm212_vm0, %v4446_v16  ;;  %v4248_v13 = vpack.c.bf16 %v3530_v11, %v3529_v10  ;;  %v3537_v15 = vld [vmem:[%s4421_s21 + $0x168] sm:$0x3]  ;;  %v3543_v17 = vld [vmem:[%s4421_s21 + $0x170] sm:$0xff]  ;;  %v3544_v18 = vld [vmem:[%s4421_s21 + $0x178] sm:$0x3] }
  0x21   : > { %4151 = vmatpush3.bf16.msk.msra.mxu0 %vm4423_vm3, %v4146_v20  ;;  %3837 = vmatmul.mubr.msk.f32.vlgmr.msra.gmra.mrb[4].mxu1 %vm212_vm0, %v4446_v16  ;;  %v4254_v20 = vpack.c.bf16 %v3537_v15, %v3536_v14  ;;  %v4260_v21 = vpack.c.bf16 %v3544_v18, %v3543_v17  ;;  %v3551_v24 = vld [vmem:[%s4421_s21 + $0x188] sm:$0x3]  ;;  %v3557_v25 = vld [vmem:[%s4421_s21 + $0x190] sm:$0xff]  ;;  %v3558_v26 = vld [vmem:[%s4421_s21 + $0x198] sm:$0x3] }
  0x22   : > { %3829 = vmatprep.mubr.msk.f32.mxu0 %vm212_vm0, %v4459_v19  ;;  %4157 = vmatpush3.bf16.msk.msra.mxu1 %vm4423_vm3, %v4152_v22  ;;  %v3550_v22 = vld [vmem:[%s4421_s21 + $0x180] sm:$0xff]  ;;  %v3565_v30 = vld [vmem:[%s4421_s21 + $0x1a8] sm:$0x3]  ;;  %v3571_v31 = vld [vmem:[%s4421_s21 + $0x1b0] sm:$0xff] }
  0x23   : > { %3839 = vmatprep.mubr.msk.f32.mxu1 %vm212_vm0, %v4459_v19  ;;  %4160 = vmatprep.subr.msk.bf16.mxu0 %vm4423_vm3, %v4158_v28  ;;  %v4266_v27 = vpack.c.bf16 %v3551_v24, %v3550_v22  ;;  %v3572_v32 = vld [vmem:[%s4421_s21 + $0x1b8] sm:$0x3]  ;;  %v3578_v35 = vld [vmem:[%s4421_s21 + $0x1c0] sm:$0xff]  ;;  %v3593_v42 = vld [vmem:[%s4421_s21 + $0x1e8] sm:$0x3] }
  0x24   : > { %3830 = vmatmul.mubr.msk.f32.gmra.mrb[6].mxu0 %vm212_vm0, %v4470_v23  ;;  %4166 = vmatprep.subr.msk.bf16.mxu1 %vm4423_vm3, %v4164_v29  ;;  %v4284_v34 = vpack.c.bf16 %v3572_v32, %v3571_v31  ;;  %v3586_v38 = vld [vmem:[%s4421_s21 + $0x1d8] sm:$0x3]  ;;  %v3592_v41 = vld [vmem:[%s4421_s21 + $0x1e0] sm:$0xff]  ;;  %v3599_v43 = vld [vmem:[%s4421_s21 + $0x1f0] sm:$0xff] }
  0x25   : > { %3840 = vmatmul.mubr.msk.f32.gmra.mrb[6].mxu1 %vm212_vm0, %v4470_v23  ;;  %3846 = vmatprep.mubr.msk.f32.mxu0 %vm212_vm0, %v4409_v0 }
  0x26   : > { %3856 = vmatprep.mubr.msk.f32.mxu1 %vm212_vm0, %v4409_v0 }
  0x28   : > { %3847 = vmatmul.mubr.msk.f32.vlgmr.msra.gmra.mrb[8].mxu0 %vm212_vm0, %v4446_v16 }
  0x29   : > { %4163 = vmatpush3.bf16.msk.msra.mxu0 %vm4423_vm3, %v4158_v28  ;;  %3857 = vmatmul.mubr.msk.f32.vlgmr.msra.gmra.mrb[8].mxu1 %vm212_vm0, %v4446_v16  ;;  %v4272_v28 = vpack.c.bf16 %v3558_v26, %v3557_v25 }
  0x2a   : > { %3849 = vmatprep.mubr.msk.f32.mxu0 %vm212_vm0, %v4459_v19  ;;  %4169 = vmatpush3.bf16.msk.msra.mxu1 %vm4423_vm3, %v4164_v29  ;;  %v3564_v29 = vld [vmem:[%s4421_s21 + $0x1a0] sm:$0xff] }
  0x2b   : > { %3859 = vmatprep.mubr.msk.f32.mxu1 %vm212_vm0, %v4459_v19  ;;  %4172 = vmatprep.subr.msk.bf16.mxu0 %vm4423_vm3, %v4170_v36  ;;  %v4278_v33 = vpack.c.bf16 %v3565_v30, %v3564_v29 }
  0x2c   : > { %3850 = vmatmul.mubr.msk.f32.gmra.mrb[10].mxu0 %vm212_vm0, %v4470_v23  ;;  %4178 = vmatprep.subr.msk.bf16.mxu1 %vm4423_vm3, %v4176_v37 }
  0x2d   : > { %3860 = vmatmul.mubr.msk.f32.gmra.mrb[10].mxu1 %vm212_vm0, %v4470_v23  ;;  %3866 = vmatprep.mubr.msk.f32.mxu0 %vm212_vm0, %v4409_v0 }
  0x2e   : > { %3876 = vmatprep.mubr.msk.f32.mxu1 %vm212_vm0, %v4409_v0 }
  0x30   : > { %3867 = vmatmul.mubr.msk.f32.vlgmr.msra.gmra.mrb[12].mxu0 %vm212_vm0, %v4446_v16 }
  0x31   : > { %4175 = vmatpush3.bf16.msk.msra.mxu0 %vm4423_vm3, %v4170_v36  ;;  %3877 = vmatmul.mubr.msk.f32.vlgmr.msra.gmra.mrb[12].mxu1 %vm212_vm0, %v4446_v16  ;;  %v3579_v36 = vld [vmem:[%s4421_s21 + $0x1c8] sm:$0x3] }
  0x32   : > { %3869 = vmatprep.mubr.msk.f32.mxu0 %vm212_vm0, %v4459_v19  ;;  %4181 = vmatpush3.bf16.msk.msra.mxu1 %vm4423_vm3, %v4176_v37  ;;  %v3585_v37 = vld [vmem:[%s4421_s21 + $0x1d0] sm:$0xff]  ;;  %v4290_v39 = vpack.c.bf16 %v3579_v36, %v3578_v35 }
  0x33   : > { %3879 = vmatprep.mubr.msk.f32.mxu1 %vm212_vm0, %v4459_v19  ;;  %4184 = vmatprep.subr.msk.bf16.mxu0 %vm4423_vm3, %v4182_v44  ;;  %v4296_v40 = vpack.c.bf16 %v3586_v38, %v3585_v37 }
  0x34   : > { %3870 = vmatmul.mubr.msk.f32.gmra.mrb[14].mxu0 %vm212_vm0, %v4470_v23  ;;  %4190 = vmatprep.subr.msk.bf16.mxu1 %vm4423_vm3, %v4188_v45 }
  0x35   : > { %3880 = vmatmul.mubr.msk.f32.gmra.mrb[14].mxu1 %vm212_vm0, %v4470_v23  ;;  %3886 = vmatprep.mubr.msk.f32.mxu0 %vm212_vm0, %v4409_v0 }
  0x36   : > { %3896 = vmatprep.mubr.msk.f32.mxu1 %vm212_vm0, %v4409_v0 }
  0x38   : > { %3887 = vmatmul.mubr.msk.f32.vlgmr.msra.gmra.mrb[16].mxu0 %vm212_vm0, %v4446_v16 }
  0x39   : > { %4187 = vmatpush3.bf16.msk.msra.mxu0 %vm4423_vm3, %v4182_v44  ;;  %3897 = vmatmul.mubr.msk.f32.vlgmr.msra.gmra.mrb[16].mxu1 %vm212_vm0, %v4446_v16  ;;  %v3600_v44 = vld [vmem:[%s4421_s21 + $0x1f8] sm:$0x3] }
  0x3a   : > { %3889 = vmatprep.mubr.msk.f32.mxu0 %vm212_vm0, %v4459_v19  ;;  %4193 = vmatpush3.bf16.msk.msra.mxu1 %vm4423_vm3, %v4188_v45  ;;  %v4302_v45 = vpack.c.bf16 %v3593_v42, %v3592_v41  ;;  %v4308_v46 = vpack.c.bf16 %v3600_v44, %v3599_v43 }
  0x3b   : > { %3899 = vmatprep.mubr.msk.f32.mxu1 %vm212_vm0, %v4459_v19  ;;  %4196 = vmatprep.subr.msk.bf16.mxu0 %vm4423_vm3, %v4194_v50 }
  0x3c   : > { %3890 = vmatmul.mubr.msk.f32.gmra.mrb[18].mxu0 %vm212_vm0, %v4470_v23  ;;  %4202 = vmatprep.subr.msk.bf16.mxu1 %vm4423_vm3, %v4200_v51 }
  0x3d   : > { %3900 = vmatmul.mubr.msk.f32.gmra.mrb[18].mxu1 %vm212_vm0, %v4470_v23  ;;  %3906 = vmatprep.mubr.msk.f32.mxu0 %vm212_vm0, %v4409_v0 }
  0x3e   : > { %3916 = vmatprep.mubr.msk.f32.mxu1 %vm212_vm0, %v4409_v0 }
  0x40   : > { %3907 = vmatmul.mubr.msk.f32.vlgmr.msra.gmra.mrb[20].mxu0 %vm212_vm0, %v4446_v16 }
  0x41   : > { %4199 = vmatpush3.bf16.msk.msra.mxu0 %vm4423_vm3, %v4194_v50  ;;  %3917 = vmatmul.mubr.msk.f32.vlgmr.msra.gmra.mrb[20].mxu1 %vm212_vm0, %v4446_v16 }
  0x42   : > { %3909 = vmatprep.mubr.msk.f32.mxu0 %vm212_vm0, %v4459_v19  ;;  %4205 = vmatpush3.bf16.msk.msra.mxu1 %vm4423_vm3, %v4200_v51 }
  0x43   : > { %3919 = vmatprep.mubr.msk.f32.mxu1 %vm212_vm0, %v4459_v19  ;;  %4208 = vmatprep.subr.msk.bf16.mxu0 %vm4423_vm3, %v4206_v56 }
  0x44   : > { %3910 = vmatmul.mubr.msk.f32.gmra.mrb[22].mxu0 %vm212_vm0, %v4470_v23  ;;  %4214 = vmatprep.subr.msk.bf16.mxu1 %vm4423_vm3, %v4212_v57 }
  0x45   : > { %3920 = vmatmul.mubr.msk.f32.gmra.mrb[22].mxu1 %vm212_vm0, %v4470_v23  ;;  %3926 = vmatprep.mubr.msk.f32.mxu0 %vm212_vm0, %v4409_v0 }
  0x46   : > { %3936 = vmatprep.mubr.msk.f32.mxu1 %vm212_vm0, %v4409_v0 }
  0x48   : > { %3927 = vmatmul.mubr.msk.f32.vlgmr.msra.gmra.mrb[24].mxu0 %vm212_vm0, %v4446_v16 }
  0x49   : > { %4211 = vmatpush3.bf16.msk.msra.mxu0 %vm4423_vm3, %v4206_v56  ;;  %3937 = vmatmul.mubr.msk.f32.vlgmr.msra.gmra.mrb[24].mxu1 %vm212_vm0, %v4446_v16 }
  0x4a   : > { %3929 = vmatprep.mubr.msk.f32.mxu0 %vm212_vm0, %v4459_v19  ;;  %4217 = vmatpush3.bf16.msk.msra.mxu1 %vm4423_vm3, %v4212_v57 }
  0x4b   : > { %3939 = vmatprep.mubr.msk.f32.mxu1 %vm212_vm0, %v4459_v19  ;;  %4220 = vmatprep.subr.msk.bf16.mxu0 %vm4423_vm3, %v4218_v62 }
  0x4c   : > { %3930 = vmatmul.mubr.msk.f32.gmra.mrb[26].mxu0 %vm212_vm0, %v4470_v23  ;;  %4226 = vmatprep.subr.msk.bf16.mxu1 %vm4423_vm3, %v4224_v63 }
  0x4d   : > { %3940 = vmatmul.mubr.msk.f32.gmra.mrb[26].mxu1 %vm212_vm0, %v4470_v23  ;;  %3946 = vmatprep.mubr.msk.f32.mxu0 %vm212_vm0, %v4409_v0 }
  0x4e   : > { %3956 = vmatprep.mubr.msk.f32.mxu1 %vm212_vm0, %v4409_v0 }
  0x50   : > { %3947 = vmatmul.mubr.msk.f32.vlgmr.msra.gmra.mrb[28].mxu0 %vm212_vm0, %v4446_v16 }
  0x51   : > { %4223 = vmatpush3.bf16.msk.msra.mxu0 %vm4423_vm3, %v4218_v62  ;;  %3957 = vmatmul.mubr.msk.f32.vlgmr.msra.gmra.mrb[28].mxu1 %vm212_vm0, %v4446_v16 }
  0x52   : > { %3949 = vmatprep.mubr.msk.f32.mxu0 %vm212_vm0, %v4459_v19  ;;  %4229 = vmatpush3.bf16.msk.msra.mxu1 %vm4423_vm3, %v4224_v63 }
  0x53   : > { %3959 = vmatprep.mubr.msk.f32.mxu1 %vm212_vm0, %v4459_v19  ;;  %4232 = vmatprep.subr.msk.bf16.mxu0 %vm4423_vm3, %v4230_v6 }
  0x54   : > { %3950 = vmatmul.mubr.msk.f32.gmra.mrb[30].mxu0 %vm212_vm0, %v4470_v23  ;;  %4238 = vmatprep.subr.msk.bf16.mxu1 %vm4423_vm3, %v4236_v7 }
  0x55   : > { %3960 = vmatmul.mubr.msk.f32.gmra.mrb[30].mxu1 %vm212_vm0, %v4470_v23  ;;  %3966 = vmatprep.mubr.msk.f32.mxu0 %vm212_vm0, %v4409_v0 }
  0x56   : > { %3976 = vmatprep.mubr.msk.f32.mxu1 %vm212_vm0, %v4409_v0 }
  0x58   : > { %3967 = vmatmul.mubr.msk.f32.vlgmr.msra.gmra.mrb[32].mxu0 %vm212_vm0, %v4446_v16 }
  0x59   : > { %4235 = vmatpush3.bf16.msk.msra.mxu0 %vm4423_vm3, %v4230_v6  ;;  %3977 = vmatmul.mubr.msk.f32.vlgmr.msra.gmra.mrb[32].mxu1 %vm212_vm0, %v4446_v16 }
  0x5a   : > { %3969 = vmatprep.mubr.msk.f32.mxu0 %vm212_vm0, %v4459_v19  ;;  %4241 = vmatpush3.bf16.msk.msra.mxu1 %vm4423_vm3, %v4236_v7 }
  0x5b   : > { %3979 = vmatprep.mubr.msk.f32.mxu1 %vm212_vm0, %v4459_v19  ;;  %4244 = vmatprep.subr.msk.bf16.mxu0 %vm4423_vm3, %v4242_v12 }
  0x5c   : > { %3970 = vmatmul.mubr.msk.f32.gmra.mrb[34].mxu0 %vm212_vm0, %v4470_v23  ;;  %4250 = vmatprep.subr.msk.bf16.mxu1 %vm4423_vm3, %v4248_v13 }
  0x5d   : > { %3980 = vmatmul.mubr.msk.f32.gmra.mrb[34].mxu1 %vm212_vm0, %v4470_v23  ;;  %3986 = vmatprep.mubr.msk.f32.mxu0 %vm212_vm0, %v4409_v0 }
  0x5e   : > { %3996 = vmatprep.mubr.msk.f32.mxu1 %vm212_vm0, %v4409_v0 }
  0x60   : > { %3987 = vmatmul.mubr.msk.f32.vlgmr.msra.gmra.mrb[36].mxu0 %vm212_vm0, %v4446_v16 }
  0x61   : > { %4247 = vmatpush3.bf16.msk.msra.mxu0 %vm4423_vm3, %v4242_v12  ;;  %3997 = vmatmul.mubr.msk.f32.vlgmr.msra.gmra.mrb[36].mxu1 %vm212_vm0, %v4446_v16 }
  0x62   : > { %3989 = vmatprep.mubr.msk.f32.mxu0 %vm212_vm0, %v4459_v19  ;;  %4253 = vmatpush3.bf16.msk.msra.mxu1 %vm4423_vm3, %v4248_v13 }
  0x63   : > { %3999 = vmatprep.mubr.msk.f32.mxu1 %vm212_vm0, %v4459_v19  ;;  %4256 = vmatprep.subr.msk.bf16.mxu0 %vm4423_vm3, %v4254_v20 }
  0x64   : > { %3990 = vmatmul.mubr.msk.f32.gmra.mrb[38].mxu0 %vm212_vm0, %v4470_v23  ;;  %4262 = vmatprep.subr.msk.bf16.mxu1 %vm4423_vm3, %v4260_v21 }
  0x65   : > { %4000 = vmatmul.mubr.msk.f32.gmra.mrb[38].mxu1 %vm212_vm0, %v4470_v23  ;;  %4006 = vmatprep.mubr.msk.f32.mxu0 %vm212_vm0, %v4409_v0 }
  0x66   : > { %4016 = vmatprep.mubr.msk.f32.mxu1 %vm212_vm0, %v4409_v0 }
  0x68   : > { %4007 = vmatmul.mubr.msk.f32.vlgmr.msra.gmra.mrb[40].mxu0 %vm212_vm0, %v4446_v16 }
  0x69   : > { %4259 = vmatpush3.bf16.msk.msra.mxu0 %vm4423_vm3, %v4254_v20  ;;  %4017 = vmatmul.mubr.msk.f32.vlgmr.msra.gmra.mrb[40].mxu1 %vm212_vm0, %v4446_v16 }
  0x6a   : > { %4009 = vmatprep.mubr.msk.f32.mxu0 %vm212_vm0, %v4459_v19  ;;  %4265 = vmatpush3.bf16.msk.msra.mxu1 %vm4423_vm3, %v4260_v21 }
  0x6b   : > { %4019 = vmatprep.mubr.msk.f32.mxu1 %vm212_vm0, %v4459_v19  ;;  %4268 = vmatprep.subr.msk.bf16.mxu0 %vm4423_vm3, %v4266_v27 }
  0x6c   : > { %4010 = vmatmul.mubr.msk.f32.gmra.mrb[42].mxu0 %vm212_vm0, %v4470_v23  ;;  %4274 = vmatprep.subr.msk.bf16.mxu1 %vm4423_vm3, %v4272_v28 }
  0x6d   : > { %4020 = vmatmul.mubr.msk.f32.gmra.mrb[42].mxu1 %vm212_vm0, %v4470_v23  ;;  %4026 = vmatprep.mubr.msk.f32.mxu0 %vm212_vm0, %v4409_v0 }
  0x6e   : > { %4036 = vmatprep.mubr.msk.f32.mxu1 %vm212_vm0, %v4409_v0 }
  0x70   : > { %4027 = vmatmul.mubr.msk.f32.vlgmr.msra.gmra.mrb[44].mxu0 %vm212_vm0, %v4446_v16 }
  0x71   : > { %4271 = vmatpush3.bf16.msk.msra.mxu0 %vm4423_vm3, %v4266_v27  ;;  %4037 = vmatmul.mubr.msk.f32.vlgmr.msra.gmra.mrb[44].mxu1 %vm212_vm0, %v4446_v16 }
  0x72   : > { %4029 = vmatprep.mubr.msk.f32.mxu0 %vm212_vm0, %v4459_v19  ;;  %4277 = vmatpush3.bf16.msk.msra.mxu1 %vm4423_vm3, %v4272_v28 }
  0x73   : > { %4039 = vmatprep.mubr.msk.f32.mxu1 %vm212_vm0, %v4459_v19  ;;  %4280 = vmatprep.subr.msk.bf16.mxu0 %vm4423_vm3, %v4278_v33 }
  0x74   : > { %4030 = vmatmul.mubr.msk.f32.gmra.mrb[46].mxu0 %vm212_vm0, %v4470_v23  ;;  %4286 = vmatprep.subr.msk.bf16.mxu1 %vm4423_vm3, %v4284_v34 }
  0x75   : > { %4040 = vmatmul.mubr.msk.f32.gmra.mrb[46].mxu1 %vm212_vm0, %v4470_v23  ;;  %4046 = vmatprep.mubr.msk.f32.mxu0 %vm212_vm0, %v4409_v0 }
  0x76   : > { %4056 = vmatprep.mubr.msk.f32.mxu1 %vm212_vm0, %v4409_v0 }
  0x78   : > { %4047 = vmatmul.mubr.msk.f32.vlgmr.msra.gmra.mrb[48].mxu0 %vm212_vm0, %v4446_v16 }
  0x79   : > { %4283 = vmatpush3.bf16.msk.msra.mxu0 %vm4423_vm3, %v4278_v33  ;;  %4057 = vmatmul.mubr.msk.f32.vlgmr.msra.gmra.mrb[48].mxu1 %vm212_vm0, %v4446_v16 }
  0x7a   : > { %4049 = vmatprep.mubr.msk.f32.mxu0 %vm212_vm0, %v4459_v19  ;;  %4289 = vmatpush3.bf16.msk.msra.mxu1 %vm4423_vm3, %v4284_v34 }
  0x7b   : > { %4059 = vmatprep.mubr.msk.f32.mxu1 %vm212_vm0, %v4459_v19  ;;  %4292 = vmatprep.subr.msk.bf16.mxu0 %vm4423_vm3, %v4290_v39 }
  0x7c   : > { %4050 = vmatmul.mubr.msk.f32.gmra.mrb[50].mxu0 %vm212_vm0, %v4470_v23  ;;  %4298 = vmatprep.subr.msk.bf16.mxu1 %vm4423_vm3, %v4296_v40 }
  0x7d   : > { %4060 = vmatmul.mubr.msk.f32.gmra.mrb[50].mxu1 %vm212_vm0, %v4470_v23  ;;  %4066 = vmatprep.mubr.msk.f32.mxu0 %vm212_vm0, %v4409_v0 }
  0x7e   : > { %4076 = vmatprep.mubr.msk.f32.mxu1 %vm212_vm0, %v4409_v0 }
  0x80   : > { %4067 = vmatmul.mubr.msk.f32.vlgmr.msra.gmra.mrb[52].mxu0 %vm212_vm0, %v4446_v16 }
  0x81   : > { %4295 = vmatpush3.bf16.msk.msra.mxu0 %vm4423_vm3, %v4290_v39  ;;  %4077 = vmatmul.mubr.msk.f32.vlgmr.msra.gmra.mrb[52].mxu1 %vm212_vm0, %v4446_v16 }
  0x82   : > { %4069 = vmatprep.mubr.msk.f32.mxu0 %vm212_vm0, %v4459_v19  ;;  %4301 = vmatpush3.bf16.msk.msra.mxu1 %vm4423_vm3, %v4296_v40 }
  0x83   : > { %4079 = vmatprep.mubr.msk.f32.mxu1 %vm212_vm0, %v4459_v19  ;;  %4304 = vmatprep.subr.msk.bf16.mxu0 %vm4423_vm3, %v4302_v45 }
  0x84   : > { %4070 = vmatmul.mubr.msk.f32.gmra.mrb[54].mxu0 %vm212_vm0, %v4470_v23  ;;  %4310 = vmatprep.subr.msk.bf16.mxu1 %vm4423_vm3, %v4308_v46 }
  0x85   : > { %4080 = vmatmul.mubr.msk.f32.gmra.mrb[54].mxu1 %vm212_vm0, %v4470_v23  ;;  %4086 = vmatprep.mubr.msk.f32.mxu0 %vm212_vm0, %v4409_v0 }
  0x86   : > { %4096 = vmatprep.mubr.msk.f32.mxu1 %vm212_vm0, %v4409_v0 }
  0x88   : > { %4087 = vmatmul.mubr.msk.f32.vlgmr.msra.gmra.mrb[56].mxu0 %vm212_vm0, %v4446_v16 }
  0x89   : > { %4307 = vmatpush3.bf16.msk.msra.mxu0 %vm4423_vm3, %v4302_v45  ;;  %4097 = vmatmul.mubr.msk.f32.vlgmr.msra.gmra.mrb[56].mxu1 %vm212_vm0, %v4446_v16 }
  0x8a   : > { %4089 = vmatprep.mubr.msk.f32.mxu0 %vm212_vm0, %v4459_v19  ;;  %4313 = vmatpush3.bf16.msk.msra.mxu1 %vm4423_vm3, %v4308_v46 }
  0x8b   : > { %4099 = vmatprep.mubr.msk.f32.mxu1 %vm212_vm0, %v4459_v19 }
  0x8c   : > { %4090 = vmatmul.mubr.msk.f32.gmra.mrb[58].mxu0 %vm212_vm0, %v4470_v23 }
  0x8d   : > { %4100 = vmatmul.mubr.msk.f32.gmra.mrb[58].mxu1 %vm212_vm0, %v4470_v23  ;;  %4106 = vmatprep.mubr.msk.f32.mxu0 %vm212_vm0, %v4409_v0 }
  0x8e   : > { %4116 = vmatprep.mubr.msk.f32.mxu1 %vm212_vm0, %v4409_v0 }
  0x90   : > { %4107 = vmatmul.mubr.msk.f32.vlgmr.msra.gmra.mrb[60].mxu0 %vm212_vm0, %v4446_v16 }
  0x91   : > { %4117 = vmatmul.mubr.msk.f32.vlgmr.msra.gmra.mrb[60].mxu1 %vm212_vm0, %v4446_v16  ;;  %4109 = vmatprep.mubr.msk.f32.mxu0 %vm212_vm0, %v4459_v19 }
  0x92   : > { %4119 = vmatprep.mubr.msk.f32.mxu1 %vm212_vm0, %v4459_v19 }
  0x94   : > { %4110 = vmatmul.mubr.msk.f32.gmra.mrb[62].mxu0 %vm212_vm0, %v4470_v23 }
  0x95   : > { %4120 = vmatmul.mubr.msk.f32.gmra.mrb[62].mxu1 %vm212_vm0, %v4470_v23 }
  0xeb   : > { %v3808_v1 = vpop.f32.mrb[0].mxu0 }
  0xec   : > { %v3818_v0 = vpop.f32.mrb[0].mxu1  ;;  %v295_v47 = vpop.f32.mrb[1].mxu0 }
  0xed   : > { %v406_v48 = vmax.f32 %v3808_v1, %v3818_v0  ;;  %v386_v49 = vpop.f32.mrb[1].mxu1 }
  0xee   : > { %v405_v50 = vmax.f32 %v295_v47, %v386_v49 }
  0xef   : > { %v3811_v51 = vpop.f32.mrb[2].mxu0 }
  0xf0   : > { %v3821_v16 = vpop.f32.mrb[2].mxu1  ;;  %v305_v52 = vpop.f32.mrb[3].mxu0 }
  0xf1   : > { %v408_v53 = vmax.f32 %v3811_v51, %v3821_v16  ;;  %v396_v54 = vpop.f32.mrb[3].mxu1 }
  0xf2   : > { %v407_v55 = vmax.f32 %v305_v52, %v396_v54 }
  0xf3   : > { %v3828_v56 = vpop.f32.mrb[4].mxu0 }
  0xf4   : > { %v501_v19 = vmax.f32 %v406_v48, %v3828_v56  ;;  %v481_v57 = vpop.f32.mrb[5].mxu0  ;;  %v3838_v58 = vpop.f32.mrb[4].mxu1 }
  0xf5   : > { %v500_v59 = vmax.f32 %v405_v50, %v481_v57  ;;  %v576_v60 = vpop.f32.mrb[5].mxu1 }
  0xf6   : > { %v596_v61 = vmax.f32 %v501_v19, %v3838_v58 }
  0xf7   : > { %v595_v23 = vmax.f32 %v500_v59, %v576_v60  ;;  %v3831_v62 = vpop.f32.mrb[6].mxu0 }
  0xf8   : > { %v503_v63 = vmax.f32 %v408_v53, %v3831_v62  ;;  %v491_v2 = vpop.f32.mrb[7].mxu0  ;;  %v3841_v3 = vpop.f32.mrb[6].mxu1 }
  0xf9   : > { %v502_v4 = vmax.f32 %v407_v55, %v491_v2  ;;  %v586_v5 = vpop.f32.mrb[7].mxu1 }
  0xfa   : > { %v598_v6 = vmax.f32 %v503_v63, %v3841_v3 }
  0xfb   : > { %v597_v7 = vmax.f32 %v502_v4, %v586_v5  ;;  %v3848_v8 = vpop.f32.mrb[8].mxu0 }
  0xfc   : > { %v691_v9 = vmax.f32 %v596_v61, %v3848_v8  ;;  %v671_v10 = vpop.f32.mrb[9].mxu0  ;;  %v3858_v11 = vpop.f32.mrb[8].mxu1 }
  0xfd   : > { %v690_v12 = vmax.f32 %v595_v23, %v671_v10  ;;  %v766_v13 = vpop.f32.mrb[9].mxu1 }
  0xfe   : > { %v786_v14 = vmax.f32 %v691_v9, %v3858_v11 }
  0xff   : > { %v785_v15 = vmax.f32 %v690_v12, %v766_v13  ;;  %v3851_v17 = vpop.f32.mrb[10].mxu0 }
 0x100   : > { %v693_v18 = vmax.f32 %v598_v6, %v3851_v17  ;;  %v681_v20 = vpop.f32.mrb[11].mxu0  ;;  %v3861_v21 = vpop.f32.mrb[10].mxu1 }
 0x101   : > { %v692_v22 = vmax.f32 %v597_v7, %v681_v20  ;;  %v776_v24 = vpop.f32.mrb[11].mxu1 }
 0x102   : > { %v788_v25 = vmax.f32 %v693_v18, %v3861_v21 }
 0x103   : > { %v787_v26 = vmax.f32 %v692_v22, %v776_v24  ;;  %v3868_v27 = vpop.f32.mrb[12].mxu0 }
 0x104   : > { %v881_v28 = vmax.f32 %v786_v14, %v3868_v27  ;;  %v861_v29 = vpop.f32.mrb[13].mxu0  ;;  %v3878_v30 = vpop.f32.mrb[12].mxu1 }
 0x105   : > { %v880_v31 = vmax.f32 %v785_v15, %v861_v29  ;;  %v956_v32 = vpop.f32.mrb[13].mxu1 }
 0x106   : > { %v976_v33 = vmax.f32 %v881_v28, %v3878_v30 }
 0x107   : > { %v975_v34 = vmax.f32 %v880_v31, %v956_v32  ;;  %v3871_v35 = vpop.f32.mrb[14].mxu0 }
 0x108   : > { %v883_v36 = vmax.f32 %v788_v25, %v3871_v35  ;;  %v871_v37 = vpop.f32.mrb[15].mxu0  ;;  %v3881_v38 = vpop.f32.mrb[14].mxu1 }
 0x109   : > { %v882_v39 = vmax.f32 %v787_v26, %v871_v37  ;;  %v966_v40 = vpop.f32.mrb[15].mxu1 }
 0x10a   : > { %v978_v41 = vmax.f32 %v883_v36, %v3881_v38 }
 0x10b   : > { %v977_v42 = vmax.f32 %v882_v39, %v966_v40  ;;  %v3888_v43 = vpop.f32.mrb[16].mxu0 }
 0x10c   : > { %v1071_v44 = vmax.f32 %v976_v33, %v3888_v43  ;;  %v1051_v45 = vpop.f32.mrb[17].mxu0  ;;  %v3898_v46 = vpop.f32.mrb[16].mxu1 }
 0x10d   : > { %v1070_v1 = vmax.f32 %v975_v34, %v1051_v45  ;;  %v1146_v0 = vpop.f32.mrb[17].mxu1 }
 0x10e   : > { %v1166_v47 = vmax.f32 %v1071_v44, %v3898_v46 }
 0x10f   : > { %v1165_v48 = vmax.f32 %v1070_v1, %v1146_v0  ;;  %v3891_v49 = vpop.f32.mrb[18].mxu0 }
 0x110   : > { %v1073_v50 = vmax.f32 %v978_v41, %v3891_v49  ;;  %v1061_v51 = vpop.f32.mrb[19].mxu0  ;;  %v3901_v16 = vpop.f32.mrb[18].mxu1 }
 0x111   : > { %v1072_v52 = vmax.f32 %v977_v42, %v1061_v51  ;;  %v1156_v53 = vpop.f32.mrb[19].mxu1 }
 0x112   : > { %v1168_v54 = vmax.f32 %v1073_v50, %v3901_v16 }
 0x113   : > { %v1167_v55 = vmax.f32 %v1072_v52, %v1156_v53  ;;  %v3908_v56 = vpop.f32.mrb[20].mxu0 }
 0x114   : > { %v1261_v19 = vmax.f32 %v1166_v47, %v3908_v56  ;;  %v1241_v57 = vpop.f32.mrb[21].mxu0  ;;  %v3918_v58 = vpop.f32.mrb[20].mxu1 }
 0x115   : > { %v1260_v59 = vmax.f32 %v1165_v48, %v1241_v57  ;;  %v1336_v60 = vpop.f32.mrb[21].mxu1 }
 0x116   : > { %v1356_v61 = vmax.f32 %v1261_v19, %v3918_v58 }
 0x117   : > { %v1355_v23 = vmax.f32 %v1260_v59, %v1336_v60  ;;  %v3911_v62 = vpop.f32.mrb[22].mxu0 }
 0x118   : > { %v1263_v63 = vmax.f32 %v1168_v54, %v3911_v62  ;;  %v1251_v2 = vpop.f32.mrb[23].mxu0  ;;  %v3921_v3 = vpop.f32.mrb[22].mxu1 }
 0x119   : > { %v1262_v4 = vmax.f32 %v1167_v55, %v1251_v2  ;;  %v1346_v5 = vpop.f32.mrb[23].mxu1 }
 0x11a   : > { %v1358_v6 = vmax.f32 %v1263_v63, %v3921_v3 }
 0x11b   : > { %v1357_v7 = vmax.f32 %v1262_v4, %v1346_v5  ;;  %v3928_v8 = vpop.f32.mrb[24].mxu0 }
 0x11c   : > { %v1451_v9 = vmax.f32 %v1356_v61, %v3928_v8  ;;  %v1431_v10 = vpop.f32.mrb[25].mxu0  ;;  %v3938_v11 = vpop.f32.mrb[24].mxu1 }
 0x11d   : > { %v1450_v12 = vmax.f32 %v1355_v23, %v1431_v10  ;;  %v1526_v13 = vpop.f32.mrb[25].mxu1 }
 0x11e   : > { %v1546_v14 = vmax.f32 %v1451_v9, %v3938_v11 }
 0x11f   : > { %v1545_v15 = vmax.f32 %v1450_v12, %v1526_v13  ;;  %v3931_v17 = vpop.f32.mrb[26].mxu0 }
 0x120   : > { %v1453_v18 = vmax.f32 %v1358_v6, %v3931_v17  ;;  %v1441_v20 = vpop.f32.mrb[27].mxu0  ;;  %v3941_v21 = vpop.f32.mrb[26].mxu1 }
 0x121   : > { %v1452_v22 = vmax.f32 %v1357_v7, %v1441_v20  ;;  %v1536_v24 = vpop.f32.mrb[27].mxu1 }
 0x122   : > { %v1548_v25 = vmax.f32 %v1453_v18, %v3941_v21 }
 0x123   : > { %v1547_v26 = vmax.f32 %v1452_v22, %v1536_v24  ;;  %v3948_v27 = vpop.f32.mrb[28].mxu0 }
 0x124   : > { %v1641_v28 = vmax.f32 %v1546_v14, %v3948_v27  ;;  %v1621_v29 = vpop.f32.mrb[29].mxu0  ;;  %v3958_v30 = vpop.f32.mrb[28].mxu1 }
 0x125   : > { %v1640_v31 = vmax.f32 %v1545_v15, %v1621_v29  ;;  %v1716_v32 = vpop.f32.mrb[29].mxu1 }
 0x126   : > { %v1736_v33 = vmax.f32 %v1641_v28, %v3958_v30 }
 0x127   : > { %v1735_v34 = vmax.f32 %v1640_v31, %v1716_v32  ;;  %v3951_v35 = vpop.f32.mrb[30].mxu0 }
 0x128   : > { %v1643_v36 = vmax.f32 %v1548_v25, %v3951_v35  ;;  %v1631_v37 = vpop.f32.mrb[31].mxu0  ;;  %v3961_v38 = vpop.f32.mrb[30].mxu1 }
 0x129   : > { %v1642_v39 = vmax.f32 %v1547_v26, %v1631_v37  ;;  %v1726_v40 = vpop.f32.mrb[31].mxu1 }
 0x12a   : > { %v1738_v41 = vmax.f32 %v1643_v36, %v3961_v38 }
 0x12b   : > { %v1737_v42 = vmax.f32 %v1642_v39, %v1726_v40  ;;  %v3968_v43 = vpop.f32.mrb[32].mxu0 }
 0x12c   : > { %v1831_v44 = vmax.f32 %v1736_v33, %v3968_v43  ;;  %v1811_v45 = vpop.f32.mrb[33].mxu0  ;;  %v3978_v46 = vpop.f32.mrb[32].mxu1 }
 0x12d   : > { %v1830_v1 = vmax.f32 %v1735_v34, %v1811_v45  ;;  %v1906_v0 = vpop.f32.mrb[33].mxu1 }
 0x12e   : > { %v1926_v47 = vmax.f32 %v1831_v44, %v3978_v46 }
 0x12f   : > { %v1925_v48 = vmax.f32 %v1830_v1, %v1906_v0  ;;  %v3971_v49 = vpop.f32.mrb[34].mxu0 }
 0x130   : > { %v1833_v50 = vmax.f32 %v1738_v41, %v3971_v49  ;;  %v1821_v51 = vpop.f32.mrb[35].mxu0  ;;  %v3981_v16 = vpop.f32.mrb[34].mxu1 }
 0x131   : > { %v1832_v52 = vmax.f32 %v1737_v42, %v1821_v51  ;;  %v1916_v53 = vpop.f32.mrb[35].mxu1 }
 0x132   : > { %v1928_v54 = vmax.f32 %v1833_v50, %v3981_v16 }
 0x133   : > { %v1927_v55 = vmax.f32 %v1832_v52, %v1916_v53  ;;  %v3988_v56 = vpop.f32.mrb[36].mxu0 }
 0x134   : > { %v2021_v19 = vmax.f32 %v1926_v47, %v3988_v56  ;;  %v2001_v57 = vpop.f32.mrb[37].mxu0  ;;  %v3998_v58 = vpop.f32.mrb[36].mxu1 }
 0x135   : > { %v2020_v59 = vmax.f32 %v1925_v48, %v2001_v57  ;;  %v2096_v60 = vpop.f32.mrb[37].mxu1 }
 0x136   : > { %v2116_v61 = vmax.f32 %v2021_v19, %v3998_v58 }
 0x137   : > { %v2115_v23 = vmax.f32 %v2020_v59, %v2096_v60  ;;  %v3991_v62 = vpop.f32.mrb[38].mxu0 }
 0x138   : > { %v2023_v63 = vmax.f32 %v1928_v54, %v3991_v62  ;;  %v2011_v2 = vpop.f32.mrb[39].mxu0  ;;  %v4001_v3 = vpop.f32.mrb[38].mxu1 }
 0x139   : > { %v2022_v4 = vmax.f32 %v1927_v55, %v2011_v2  ;;  %v2106_v5 = vpop.f32.mrb[39].mxu1 }
 0x13a   : > { %v2118_v6 = vmax.f32 %v2023_v63, %v4001_v3 }
 0x13b   : > { %v2117_v7 = vmax.f32 %v2022_v4, %v2106_v5  ;;  %v4008_v8 = vpop.f32.mrb[40].mxu0 }
 0x13c   : > { %v2211_v9 = vmax.f32 %v2116_v61, %v4008_v8  ;;  %v2191_v10 = vpop.f32.mrb[41].mxu0  ;;  %v4018_v11 = vpop.f32.mrb[40].mxu1 }
 0x13d   : > { %v2210_v12 = vmax.f32 %v2115_v23, %v2191_v10  ;;  %v2286_v13 = vpop.f32.mrb[41].mxu1 }
 0x13e   : > { %v2306_v14 = vmax.f32 %v2211_v9, %v4018_v11 }
 0x13f   : > { %v2305_v15 = vmax.f32 %v2210_v12, %v2286_v13  ;;  %v4011_v17 = vpop.f32.mrb[42].mxu0 }
 0x140   : > { %v2213_v18 = vmax.f32 %v2118_v6, %v4011_v17  ;;  %v2201_v20 = vpop.f32.mrb[43].mxu0  ;;  %v4021_v21 = vpop.f32.mrb[42].mxu1 }
 0x141   : > { %v2212_v22 = vmax.f32 %v2117_v7, %v2201_v20  ;;  %v2296_v24 = vpop.f32.mrb[43].mxu1 }
 0x142   : > { %v2308_v25 = vmax.f32 %v2213_v18, %v4021_v21  ;;  %v3262_v18 = vpop.permute.xlu0 %3261 }
 0x143   : > { %v2307_v26 = vmax.f32 %v2212_v22, %v2296_v24  ;;  %v4028_v27 = vpop.f32.mrb[44].mxu0 }
 0x144   : > { %v2401_v28 = vmax.f32 %v2306_v14, %v4028_v27  ;;  %v2381_v29 = vpop.f32.mrb[45].mxu0  ;;  %v4038_v30 = vpop.f32.mrb[44].mxu1 }
 0x145   : > { %v2400_v31 = vmax.f32 %v2305_v15, %v2381_v29  ;;  %v2476_v32 = vpop.f32.mrb[45].mxu1  ;;  %v3272_v29 = vpop.permute.xlu1 %3271 }
 0x146   : > { %v2496_v33 = vmax.f32 %v2401_v28, %v4038_v30 }
 0x147   : > { %v2495_v34 = vmax.f32 %v2400_v31, %v2476_v32  ;;  %v4031_v35 = vpop.f32.mrb[46].mxu0 }
 0x148   : > { %v2403_v36 = vmax.f32 %v2308_v25, %v4031_v35  ;;  %v2391_v37 = vpop.f32.mrb[47].mxu0  ;;  %v4041_v38 = vpop.f32.mrb[46].mxu1 }
 0x149   : > { %v2402_v39 = vmax.f32 %v2307_v26, %v2391_v37  ;;  %v2486_v40 = vpop.f32.mrb[47].mxu1  ;;  %v3267_v35 = vpop.permute.xlu0 %3266 }
 0x14a   : > { %v2498_v41 = vmax.f32 %v2403_v36, %v4041_v38 }
 0x14b   : > { %v2497_v42 = vmax.f32 %v2402_v39, %v2486_v40  ;;  %v4048_v43 = vpop.f32.mrb[48].mxu0 }
 0x14c   : > { %v2591_v44 = vmax.f32 %v2496_v33, %v4048_v43  ;;  %v2571_v45 = vpop.f32.mrb[49].mxu0  ;;  %v4058_v46 = vpop.f32.mrb[48].mxu1 }
 0x14d   : > { %v2590_v1 = vmax.f32 %v2495_v34, %v2571_v45  ;;  %v2666_v0 = vpop.f32.mrb[49].mxu1 }
 0x14e   : > { %v2686_v47 = vmax.f32 %v2591_v44, %v4058_v46 }
 0x14f   : > { %v2685_v48 = vmax.f32 %v2590_v1, %v2666_v0  ;;  %v4051_v49 = vpop.f32.mrb[50].mxu0 }
 0x150   : > { %v2593_v50 = vmax.f32 %v2498_v41, %v4051_v49  ;;  %v2581_v51 = vpop.f32.mrb[51].mxu0  ;;  %v4061_v16 = vpop.f32.mrb[50].mxu1 }
 0x151   : > { %v2592_v52 = vmax.f32 %v2497_v42, %v2581_v51  ;;  %v2676_v53 = vpop.f32.mrb[51].mxu1 }
 0x152   : > { %v2688_v54 = vmax.f32 %v2593_v50, %v4061_v16 }
 0x153   : > { %v2687_v55 = vmax.f32 %v2592_v52, %v2676_v53  ;;  %v4068_v56 = vpop.f32.mrb[52].mxu0 }
 0x154   : > { %v2781_v19 = vmax.f32 %v2686_v47, %v4068_v56  ;;  %v2761_v57 = vpop.f32.mrb[53].mxu0  ;;  %v4078_v58 = vpop.f32.mrb[52].mxu1 }
 0x155   : > { %v2780_v59 = vmax.f32 %v2685_v48, %v2761_v57  ;;  %v2856_v60 = vpop.f32.mrb[53].mxu1  ;;  %v3277_v47 = vpop.permute.xlu1 %3276 }
 0x156   : > { %v2876_v61 = vmax.f32 %v2781_v19, %v4078_v58 }
 0x157   : > { %v2875_v23 = vmax.f32 %v2780_v59, %v2856_v60  ;;  %v4071_v62 = vpop.f32.mrb[54].mxu0 }
 0x158   : > { %v2783_v63 = vmax.f32 %v2688_v54, %v4071_v62  ;;  %v2771_v2 = vpop.f32.mrb[55].mxu0  ;;  %v4081_v3 = vpop.f32.mrb[54].mxu1 }
 0x159   : > { %v2782_v4 = vmax.f32 %v2687_v55, %v2771_v2  ;;  %v2866_v5 = vpop.f32.mrb[55].mxu1 }
 0x15a   : > { %v2878_v6 = vmax.f32 %v2783_v63, %v4081_v3 }
 0x15b   : > { %v2877_v7 = vmax.f32 %v2782_v4, %v2866_v5  ;;  %v4088_v8 = vpop.f32.mrb[56].mxu0 }
 0x15c   : > { %v2971_v9 = vmax.f32 %v2876_v61, %v4088_v8  ;;  %v2951_v10 = vpop.f32.mrb[57].mxu0  ;;  %v4098_v11 = vpop.f32.mrb[56].mxu1 }
 0x15d   : > { %v2970_v12 = vmax.f32 %v2875_v23, %v2951_v10  ;;  %v3046_v13 = vpop.f32.mrb[57].mxu1 }
 0x15e   : > { %v3066_v14 = vmax.f32 %v2971_v9, %v4098_v11 }
 0x15f   : > { %v3065_v15 = vmax.f32 %v2970_v12, %v3046_v13  ;;  %v4091_v17 = vpop.f32.mrb[58].mxu0 }
 0x160   : > { %v2973_v20 = vmax.f32 %v2878_v6, %v4091_v17  ;;  %v2961_v21 = vpop.f32.mrb[59].mxu0  ;;  %v4101_v22 = vpop.f32.mrb[58].mxu1 }
 0x161   : > { %v2972_v24 = vmax.f32 %v2877_v7, %v2961_v21  ;;  %v3056_v25 = vpop.f32.mrb[59].mxu1 }
 0x162   : > { %v3068_v26 = vmax.f32 %v2973_v20, %v4101_v22 }
 0x163   : > { %v3067_v27 = vmax.f32 %v2972_v24, %v3056_v25  ;;  %v4108_v28 = vpop.f32.mrb[60].mxu0 }
 0x164   : > { %v3161_v30 = vmax.f32 %v3066_v14, %v4108_v28  ;;  %v3141_v31 = vpop.f32.mrb[61].mxu0  ;;  %v4118_v32 = vpop.f32.mrb[60].mxu1 }
 0x165   : > { %v3160_v33 = vmax.f32 %v3065_v15, %v3141_v31  ;;  %v3236_v34 = vpop.f32.mrb[61].mxu1 }
 0x166   : > { %v3256_v36 = vmax.f32 %v3161_v30, %v4118_v32 }
 0x167   : > { %v3255_v37 = vmax.f32 %v3160_v33, %v3236_v34  ;;  %v4111_v38 = vpop.f32.mrb[62].mxu0 }
 0x168   : > { %v3280_v39 = vadd.f32 %v3267_v35, %v3256_v36  ;;  %v3163_v40 = vmax.f32 %v3068_v26, %v4111_v38  ;;  %v3151_v41 = vpop.f32.mrb[63].mxu0  ;;  %v4121_v42 = vpop.f32.mrb[62].mxu1 }
 0x169   : > { %v3279_v43 = vadd.f32 %v3262_v18, %v3255_v37  ;;  %v3162_v44 = vmax.f32 %v3067_v27, %v3151_v41  ;;  %v3246_v45 = vpop.f32.mrb[63].mxu1 }
 0x16a   : > { %v3284_v46 = vmax.f32 %v3280_v39, 0.0  ;;  %v3258_v1 = vmax.f32 %v3163_v40, %v4121_v42 }
 0x16b   : > { %v3283_v0 = vmax.f32 %v3279_v43, 0.0  ;;  %v3257_v48 = vmax.f32 %v3162_v44, %v3246_v45 }
 0x16c   : > { %3289 = vst.msk [vmem:[%s201_s16 + $0x8] sm:$0xff] %vm3287_vm4, %v3284_v46  ;;  %v3282_v49 = vadd.f32 %v3277_v47, %v3258_v1 }
 0x16d   : > { %3288 = vst.msk [vmem:[%s201_s16] sm:$0xff] %vm3287_vm4, %v3283_v0  ;;  %v3281_v50 = vadd.f32 %v3272_v29, %v3257_v48 }
 0x16e   : > { %v3286_v51 = vmax.f32 %v3282_v49, 0.0 }
 0x16f   : > { %v3285_v16 = vmax.f32 %v3281_v50, 0.0 }
 0x170   : > { %3291 = vst.msk [vmem:[%s201_s16 + $0x18] sm:$0xff] %vm3287_vm4, %v3286_v51 }
 0x171   : > { %3290 = vst.msk [vmem:[%s201_s16 + $0x10] sm:$0xff] %vm3287_vm4, %v3285_v16 }
 0x172 PF: > { %s13_s14 = sadd.s32 1, %s4364_s14   ;;  %s4917_s12 = smov %s4360_s13 }
 0x173   : > { %p10_p5 = scmp.ge.s32.totalorder %s13_s14, 4   ;;  %s4918_s13 = smov %s4920_s15 }
 0x175   :  { %12 = sbr.rel (!%p10_p5) target bundleno = 2 (0x2), region = 93 }

</bundles_post_ra>
